<compile_context>
chip_gen: v6e
topology: v6e:2x2x1
jax: 0.10.0
libtpu: 0.0.40
codegen_flags: <defaults>
</compile_context>

<pallas_src>
import math
from functools import partial

import jax
import jax.numpy as jnp
from jax import lax
from jax.experimental import pallas as pl
from jax.experimental.pallas import tpu as pltpu


def _round_up(x, m):
    return (x + m - 1) // m * m


def _attention_pool_kernel(x_ref, q_ref, kvb_ref, wkv_ref, wc_ref, bc_ref,
                           o_ref, a_ref, *, ch, nh, t_real, t_pad, bb):
    # x_ref:   [1, C, bb*T_pad] bf16  tokens of bb batch elems on lanes (no pos)
    # q_ref:   [1, C, bb]       f32   pre-scaled token-0 query columns
    # kvb_ref: [2C, T_pad]      f32   Wkv @ pos + bkv (padded columns are zero)
    # wkv_ref: [2C, C]          bf16
    # wc_ref:  [Cout, C]        bf16
    # bc_ref:  [1, Cout]        f32
    # o_ref:   [1, bb, Cout]          lane-dense output block
    # a_ref:   [C, bb]          f32   VMEM scratch (attention-output columns)
    C = wkv_ref.shape[1]
    f32 = jnp.float32

    # Dominant matmul: [2C, C] x [C, bb*T_pad] in bf16, f32 accumulation.
    kv = jnp.dot(wkv_ref[...], x_ref[0], preferred_element_type=f32)
    q0 = q_ref[0]                                    # [C, bb] f32 (already * 1/sqrt(ch))
    kvb = kvb_ref[...]                               # [2C, T_pad] f32

    # Additive -inf mask on padded key columns (static; skipped if T == T_pad).
    if t_real < t_pad:
        lane_t = lax.broadcasted_iota(jnp.int32, (nh, t_pad), 1)
        smask = jnp.where(lane_t < t_real, jnp.float32(0.0), jnp.float32(-1e30))
    else:
        smask = None

    # Per-batch-element softmax / head bookkeeping. bb is small and T_pad is a
    # multiple of 128, so these static lane slices are aligned, free views.
    # TODO(synk): for large bb switch to lax.fori_loop over a KV scratch ref.
    for b in range(bb):
        lo = b * t_pad
        kb = kv[0:C, lo:lo + t_pad] + kvb[0:C]               # [C, T_pad] f32
        vb = kv[C:2 * C, lo:lo + t_pad] + kvb[C:2 * C]       # [C, T_pad] f32
        qb = q0[:, b:b + 1]                                  # [C, 1]

        # Per-head scores: heads are contiguous ch-blocks of channels, so this
        # is a VPU multiply + channel reduce (no nh-sized MXU matmul).
        s = jnp.sum((kb * qb).reshape(nh, ch, t_pad), axis=1)    # [nh, T_pad]
        if smask is not None:
            s = s + smask
        s = s - jnp.max(s, axis=-1, keepdims=True)
        p = jnp.exp(s)
        p = p * pl.reciprocal(jnp.sum(p, axis=-1, keepdims=True), approx=True)

        # Broadcast per-head weights back onto channels and reduce over tokens:
        # a[c] = sum_t v[c, t] * p[head(c), t]   (VPU mul + lane reduce).
        pc = jnp.broadcast_to(p[:, None, :], (nh, ch, t_pad)).reshape(C, t_pad)
        a_ref[:, b:b + 1] = jnp.sum(vb * pc, axis=-1, keepdims=True)

    # Output projection for token 0 only, emitted lane-dense as [bb, Cout].
    out = lax.dot_general(a_ref[...].astype(jnp.bfloat16), wc_ref[...],
                          dimension_numbers=(((0,), (1,)), ((), ())),
                          preferred_element_type=f32)             # [bb, Cout]
    o_ref[0] = (out + bc_ref[...]).astype(o_ref.dtype)


def _tpu_vmem_capacity_bytes():
    try:
        return int(pltpu.get_tpu_info().vmem_capacity_bytes)
    except Exception:
        return 64 << 20          # conservative fallback (v7x per-core VMEM)


def _tpu_num_tensorcores():
    try:
        info = pltpu.get_tpu_info()
        for attr in ("num_cores", "num_tensorcores", "tensorcore_count",
                     "cores_per_chip"):
            v = getattr(info, attr, None)
            if isinstance(v, int) and v > 0:
                return v
    except Exception:
        pass
    try:
        v = getattr(jax.devices()[0], "num_cores", None)
        if isinstance(v, int) and v > 0:
            return v
    except Exception:
        pass
    return 1


def _pick_block_batch(B, t_pad, num_cores):
    # Wide lanes amortize per-grid-step overhead; on multi-TensorCore chips
    # (v7x) keep >= num_cores grid steps so "parallel" actually shards.
    target_lanes = 1024 if num_cores > 1 else 2048
    bb = max(1, min(B, target_lanes // max(t_pad, 1)))
    if num_cores > 1 and B > 1:
        bb = min(bb, max(1, B // num_cores))
    while B % bb:
        bb -= 1
    return bb


def attention_pool_2d(x, params, num_heads, block_batch=None):
    """x: [B, C, H, W] (NCHW). Returns [B, Cout] (token 0 of c_proj(attn(.)))."""
    B, C, H, W = x.shape
    T = H * W + 1
    ch = C // num_heads
    t_pad = _round_up(T, 128)

    pos = params["pos"].astype(jnp.float32)          # [C, T]
    wqkv = params["wqkv"].astype(jnp.float32)        # [3C, C]
    bqkv = params["bqkv"].astype(jnp.float32)        # [3C, 1]
    wc = params["wc"].astype(jnp.float32)            # [Cout, C]
    bc = params["bc"].astype(jnp.float32)            # [Cout, 1]
    Cout = wc.shape[0]

    num_cores = _tpu_num_tensorcores()
    bb = (_pick_block_batch(B, t_pad, num_cores)
          if block_batch is None else block_batch)
    assert B % bb == 0, (B, bb)
    nb = B // bb

    # ---- layout / folding glue (plain XLA; fuses, negligible vs kernel) ----
    x_flat = x.reshape(B, C, H * W)
    x_tok = jnp.concatenate([x_flat.mean(axis=-1, keepdims=True), x_flat],
                            axis=-1)                                  # [B, C, T]
    x_pad = jnp.pad(x_tok, ((0, 0), (0, 0), (0, t_pad - T)))
    x_blk = (x_pad.reshape(nb, bb, C, t_pad)
                  .transpose(0, 2, 1, 3)
                  .reshape(nb, C, bb * t_pad)).astype(jnp.bfloat16)   # [nb, C, bb*T_pad]

    wq, wkv = wqkv[:C], wqkv[C:]                     # [C, C], [2C, C]
    bq, bkv = bqkv[:C], bqkv[C:]                     # [C, 1], [2C, 1]

    # pos folded into an f32 bias for the KV projection (no tiled pos buffer).
    kvb = jnp.pad(wkv @ pos + bkv, ((0, 0), (0, t_pad - T)))          # [2C, T_pad]

    # token-0 query projection in the wrapper (in-kernel N would only be bb);
    # the reference's 1/sqrt(sqrt(ch)) on both q and k == 1/sqrt(ch) on q.
    q_in = x_tok[:, :, 0] + pos[:, 0][None, :]                        # [B, C]
    q0 = (q_in @ wq.T + bq[:, 0][None, :]) * (1.0 / math.sqrt(ch))    # [B, C]
    q_blk = q0.reshape(nb, bb, C).transpose(0, 2, 1)                  # [nb, C, bb]

    wkv_bf = wkv.astype(jnp.bfloat16)
    wc_bf = wc.astype(jnp.bfloat16)
    bc_row = bc.reshape(1, Cout)                                      # lane-dense bias
    # -------------------------------------------------------------------------

    kernel = partial(_attention_pool_kernel, ch=ch, nh=num_heads,
                     t_real=T, t_pad=t_pad, bb=bb)

    def _nbytes(shape, dtype):
        return math.prod(shape) * jnp.dtype(dtype).itemsize

    def _run(single_buffer_consts):
        def const_spec(shape):
            idx = lambda i, n=len(shape): (0,) * n
            if single_buffer_consts:
                return pl.BlockSpec(shape, idx, pipeline_mode=pl.Buffered(1))
            return pl.BlockSpec(shape, idx)

        const_bufs = 1 if single_buffer_consts else 2
        resident = (
            2 * _nbytes((C, bb * t_pad), jnp.bfloat16)        # x block (double buf)
            + 2 * _nbytes((C, bb), jnp.float32)               # q block
            + 2 * _nbytes((bb, Cout), x.dtype)                # out block
            + const_bufs * (_nbytes((2 * C, t_pad), jnp.float32)
                            + _nbytes((2 * C, C), jnp.bfloat16)
                            + _nbytes((Cout, C), jnp.bfloat16)
                            + _nbytes((1, Cout), jnp.float32))
            + _nbytes((2 * C, bb * t_pad), jnp.float32)       # kv intermediate
            + 4 * _nbytes((C, t_pad), jnp.float32)            # per-b temporaries
            + _nbytes((C, bb), jnp.float32))                  # scratch accumulator
        vmem_cap = _tpu_vmem_capacity_bytes()
        vmem_limit = int(min(max(resident + (2 << 20), 16 << 20),
                             int(0.8 * vmem_cap)))

        cost = pl.CostEstimate(
            flops=int(nb * (2 * (2 * C) * C * bb * t_pad      # KV projection
                            + 2 * C * Cout * bb               # c_proj
                            + 6 * C * bb * t_pad)),           # scores + AV (VPU)
            transcendentals=int(nb * bb * num_heads * t_pad),
            bytes_accessed=int(
                _nbytes((nb, C, bb * t_pad), jnp.bfloat16)
                + _nbytes((nb, C, bb), jnp.float32)
                + _nbytes((2 * C, t_pad), jnp.float32)
                + _nbytes((2 * C, C), jnp.bfloat16)
                + _nbytes((Cout, C), jnp.bfloat16)
                + _nbytes((1, Cout), jnp.float32)
                + _nbytes((nb, bb, Cout), x.dtype)))

        return pl.pallas_call(
            kernel,
            out_shape=jax.ShapeDtypeStruct((nb, bb, Cout), x.dtype),
            grid=(nb,),
            in_specs=[
                pl.BlockSpec((1, C, bb * t_pad), lambda i: (i, 0, 0)),   # x block
                pl.BlockSpec((1, C, bb), lambda i: (i, 0, 0)),           # q0 block
                const_spec((2 * C, t_pad)),                              # kv pos bias
                const_spec((2 * C, C)),                                  # Wkv (bf16)
                const_spec((Cout, C)),                                   # Wc  (bf16)
                const_spec((1, Cout)),                                   # bc
            ],
            out_specs=pl.BlockSpec((1, bb, Cout), lambda i: (i, 0, 0)),
            scratch_shapes=[pltpu.VMEM((C, bb), jnp.float32)],
            compiler_params=pltpu.CompilerParams(
                dimension_semantics=("parallel",),
                vmem_limit_bytes=vmem_limit),
            cost_estimate=cost,
        )(x_blk, q_blk, kvb, wkv_bf, wc_bf, bc_row)

    # TODO(synk): for real CLIP widths (C >= 1024) add a K-tiled reduction grid
    # axis over the channel contraction so per-step weight residency is
    # tk-sized (needed to keep wide bb within v7x's 64 MiB VMEM).
    try:
        out = jax.block_until_ready(_run(single_buffer_consts=True))
    except Exception:
        # pipeline_mode=pl.Buffered(1) unsupported on this JAX build — fall
        # back to the default double-buffered grid-invariant inputs.
        out = _run(single_buffer_consts=False)

    return out.reshape(B, Cout)


def _reference(x, params, num_heads):
    """Pure-JAX reference mirroring the PyTorch module (full attention)."""
    B, C, H, W = x.shape
    xf = x.reshape(B, C, -1)
    xt = jnp.concatenate([xf.mean(-1, keepdims=True), xf], axis=-1)
    xt = xt + params["pos"][None]
    qkv = jnp.einsum("oc,bct->bot", params["wqkv"], xt) + params["bqkv"][None]
    ch = C // num_heads
    q, k, v = jnp.split(qkv, 3, axis=1)
    q = q.reshape(B * num_heads, ch, -1)
    k = k.reshape(B * num_heads, ch, -1)
    v = v.reshape(B * num_heads, ch, -1)
    scale = 1.0 / math.sqrt(math.sqrt(ch))
    w = jnp.einsum("bct,bcs->bts", q * scale, k * scale)
    w = jax.nn.softmax(w, axis=-1)
    a = jnp.einsum("bts,bcs->bct", w, v).reshape(B, C, -1)
    out = jnp.einsum("oc,bct->bot", params["wc"], a) + params["bc"][None]
    return out[:, :, 0]


def init_params(key, spacial_dim, embed_dim, output_dim):
    T = spacial_dim ** 2 + 1
    k0, k1, k2, k3, k4 = jax.random.split(key, 5)
    return {
        # positional_embedding = randn(embed_dim, spacial_dim**2 + 1) / embed_dim**0.5
        "pos": jax.random.normal(k0, (embed_dim, T), jnp.float32) / embed_dim ** 0.5,
        # qkv_proj: Conv1d(embed_dim, 3*embed_dim, 1) -> weight [3C, C], bias [3C, 1]
        "wqkv": 0.05 * jax.random.normal(k1, (3 * embed_dim, embed_dim), jnp.float32),
        "bqkv": 0.05 * jax.random.normal(k2, (3 * embed_dim, 1), jnp.float32),
        # c_proj: Conv1d(embed_dim, output_dim, 1) -> weight [Cout, C], bias [Cout, 1]
        "wc": 0.05 * jax.random.normal(k3, (output_dim, embed_dim), jnp.float32),
        "bc": 0.05 * jax.random.normal(k4, (output_dim, 1), jnp.float32),
    }


if __name__ == "__main__":
    # Small, consistent shapes: spacial_dim=8, embed_dim=32, num_heads_channels=8
    B, embed_dim, spacial_dim = 2, 32, 8
    num_heads_channels = 8
    output_dim = 32
    num_heads = embed_dim // num_heads_channels

    key = jax.random.PRNGKey(0)
    kx, kp = jax.random.split(key)
    x = jax.random.normal(kx, (B, embed_dim, spacial_dim, spacial_dim), jnp.float32)
    params = init_params(kp, spacial_dim, embed_dim, output_dim)

    out = attention_pool_2d(x, params, num_heads)
    out = jax.block_until_ready(out)

    ref = _reference(x, params, num_heads)
    assert out.shape == (B, output_dim), out.shape
    # tolerance covers bf16 MXU matmuls + the approximate (EUP) softmax reciprocal
    assert jnp.allclose(out, ref, rtol=2e-2, atol=2e-2), (
        f"max abs err {jnp.max(jnp.abs(out - ref))}")

    print("KERNEL_OK")
</pallas_src>

<mosaic_0001>
module attributes {stable_mosaic.version = 11 : i64} {
  func.func @_attention_pool_kernel(%arg0: i32, %arg1: memref<1x32x256xbf16, #tpu.memory_space<vmem>>, %arg2: memref<1x32x2xf32, #tpu.memory_space<vmem>>, %arg3: memref<64x128xf32, #tpu.memory_space<vmem>>, %arg4: memref<64x32xbf16, #tpu.memory_space<vmem>>, %arg5: memref<32x32xbf16, #tpu.memory_space<vmem>>, %arg6: memref<1x32xf32, #tpu.memory_space<vmem>>, %arg7: memref<1x2x32xf32, #tpu.memory_space<vmem>>, %arg8: memref<32x2xf32, #tpu.memory_space<vmem>>) attributes {dimension_semantics = [#tpu.dimension_semantics<parallel>], iteration_bounds = array<i64: 1>, scalar_prefetch = 0 : i64, scratch_operands = 1 : i64, tpu.core_type = #tpu.core_type<tc>, window_params = [{transform_indices = @transform_0, window_bounds = array<i64: 1, 32, 256>}, {transform_indices = @transform_1, window_bounds = array<i64: 1, 32, 2>}, {pipeline_mode = #tpu.pipeline_mode<synchronous>, transform_indices = @transform_2, window_bounds = array<i64: 64, 128>}, {pipeline_mode = #tpu.pipeline_mode<synchronous>, transform_indices = @transform_3, window_bounds = array<i64: 64, 32>}, {pipeline_mode = #tpu.pipeline_mode<synchronous>, transform_indices = @transform_4, window_bounds = array<i64: 32, 32>}, {pipeline_mode = #tpu.pipeline_mode<synchronous>, transform_indices = @transform_5, window_bounds = array<i64: 1, 32>}, {transform_indices = @transform_6, window_bounds = array<i64: 1, 2, 32>}]} {
    %c0 = arith.constant 0 : index
    %c0_0 = arith.constant 0 : index
    %0 = vector.load %arg4[%c0, %c0_0] : memref<64x32xbf16, #tpu.memory_space<vmem>>, vector<64x32xbf16>
    %c0_1 = arith.constant 0 : index
    %c0_2 = arith.constant 0 : index
    %c0_3 = arith.constant 0 : index
    %1 = vector.load %arg1[%c0_1, %c0_2, %c0_3] : memref<1x32x256xbf16, #tpu.memory_space<vmem>>, vector<1x32x256xbf16>
    %2 = vector.shape_cast %1 : vector<1x32x256xbf16> to vector<32x256xbf16>
    %cst = arith.constant dense<0.000000e+00> : vector<64x256xf32>
    %3 = tpu.matmul %0, %2, %cst {dimension_numbers = #tpu.dot_dimension_numbers<[1], [0], [0], [1], [0, 0, 1, 1], [], []>} : vector<64x32xbf16>, vector<32x256xbf16>, vector<64x256xf32> -> vector<64x256xf32>
    %c0_4 = arith.constant 0 : index
    %c0_5 = arith.constant 0 : index
    %c0_6 = arith.constant 0 : index
    %4 = vector.load %arg2[%c0_4, %c0_5, %c0_6] : memref<1x32x2xf32, #tpu.memory_space<vmem>>, vector<1x32x2xf32>
    %5 = vector.shape_cast %4 : vector<1x32x2xf32> to vector<32x2xf32>
    %c0_7 = arith.constant 0 : index
    %c0_8 = arith.constant 0 : index
    %6 = vector.load %arg3[%c0_7, %c0_8] : memref<64x128xf32, #tpu.memory_space<vmem>>, vector<64x128xf32>
    %7 = tpu.iota {dimensions = array<i32: 1>} : vector<4x128xi32>
    %c65_i32 = arith.constant 65 : i32
    %8 = vector.broadcast %c65_i32 : i32 to vector<4x128xi32>
    %9 = arith.cmpi slt, %7, %8 : vector<4x128xi32>
    %cst_9 = arith.constant 0.000000e+00 : f32
    %cst_10 = arith.constant -1.000000e+30 : f32
    %10 = vector.broadcast %cst_9 : f32 to vector<4x128xf32>
    %11 = vector.broadcast %cst_10 : f32 to vector<4x128xf32>
    %12 = arith.select %9, %10, %11 : vector<4x128xi1>, vector<4x128xf32>
    %13 = vector.extract_strided_slice %3 {offsets = [0, 0], sizes = [32, 128], strides = [1, 1]} : vector<64x256xf32> to vector<32x128xf32>
    %14 = vector.extract_strided_slice %6 {offsets = [0, 0], sizes = [32, 128], strides = [1, 1]} : vector<64x128xf32> to vector<32x128xf32>
    %15 = arith.addf %13, %14 : vector<32x128xf32>
    %16 = vector.extract_strided_slice %3 {offsets = [32, 0], sizes = [32, 128], strides = [1, 1]} : vector<64x256xf32> to vector<32x128xf32>
    %17 = vector.extract_strided_slice %6 {offsets = [32, 0], sizes = [32, 128], strides = [1, 1]} : vector<64x128xf32> to vector<32x128xf32>
    %18 = arith.addf %16, %17 : vector<32x128xf32>
    %19 = vector.extract_strided_slice %5 {offsets = [0, 0], sizes = [32, 1], strides = [1, 1]} : vector<32x2xf32> to vector<32x1xf32>
    %20 = vector.broadcast %19 : vector<32x1xf32> to vector<32x128xf32>
    %21 = arith.mulf %15, %20 : vector<32x128xf32>
    %22 = vector.shape_cast %21 : vector<32x128xf32> to vector<4x8x128xf32>
    %cst_11 = arith.constant dense<0.000000e+00> : vector<4x128xf32>
    %23 = vector.multi_reduction <add>, %22, %cst_11 [1] : vector<4x8x128xf32> to vector<4x128xf32>
    %24 = arith.addf %23, %12 : vector<4x128xf32>
    %cst_12 = arith.constant dense<0xFF800000> : vector<4xf32>
    %25 = vector.multi_reduction <maximumf>, %24, %cst_12 [1] : vector<4x128xf32> to vector<4xf32>
    %26 = vector.shape_cast %25 : vector<4xf32> to vector<4x1xf32>
    %27 = vector.broadcast %26 : vector<4x1xf32> to vector<4x128xf32>
    %28 = arith.subf %24, %27 : vector<4x128xf32>
    %29 = math.exp %28 : vector<4x128xf32>
    %cst_13 = arith.constant dense<0.000000e+00> : vector<4xf32>
    %30 = vector.multi_reduction <add>, %29, %cst_13 [1] : vector<4x128xf32> to vector<4xf32>
    %31 = vector.shape_cast %30 : vector<4xf32> to vector<4x1xf32>
    %32 = tpu.reciprocal %31 {approx = true} : vector<4x1xf32> -> vector<4x1xf32>
    %33 = vector.broadcast %32 : vector<4x1xf32> to vector<4x128xf32>
    %34 = arith.mulf %29, %33 : vector<4x128xf32>
    %35 = vector.shape_cast %34 : vector<4x128xf32> to vector<4x1x128xf32>
    %36 = vector.shape_cast %35 : vector<4x1x128xf32> to vector<4x1x128xf32>
    %37 = vector.broadcast %36 : vector<4x1x128xf32> to vector<4x8x128xf32>
    %38 = vector.shape_cast %37 : vector<4x8x128xf32> to vector<32x128xf32>
    %39 = arith.mulf %18, %38 : vector<32x128xf32>
    %cst_14 = arith.constant dense<0.000000e+00> : vector<32xf32>
    %40 = vector.multi_reduction <add>, %39, %cst_14 [1] : vector<32x128xf32> to vector<32xf32>
    %41 = vector.shape_cast %40 : vector<32xf32> to vector<32x1xf32>
    %c0_15 = arith.constant 0 : index
    %c0_16 = arith.constant 0 : index
    %42 = vector.load %arg8[%c0_15, %c0_16] : memref<32x2xf32, #tpu.memory_space<vmem>>, vector<32x1xf32>
    tpu.vector_store %arg8[%c0_15, %c0_16], %41 {strides = array<i32>} : memref<32x2xf32, #tpu.memory_space<vmem>>, vector<32x1xf32>,
    %43 = vector.extract_strided_slice %3 {offsets = [0, 128], sizes = [32, 128], strides = [1, 1]} : vector<64x256xf32> to vector<32x128xf32>
    %44 = vector.extract_strided_slice %6 {offsets = [0, 0], sizes = [32, 128], strides = [1, 1]} : vector<64x128xf32> to vector<32x128xf32>
    %45 = arith.addf %43, %44 : vector<32x128xf32>
    %46 = vector.extract_strided_slice %3 {offsets = [32, 128], sizes = [32, 128], strides = [1, 1]} : vector<64x256xf32> to vector<32x128xf32>
    %47 = vector.extract_strided_slice %6 {offsets = [32, 0], sizes = [32, 128], strides = [1, 1]} : vector<64x128xf32> to vector<32x128xf32>
    %48 = arith.addf %46, %47 : vector<32x128xf32>
    %49 = vector.extract_strided_slice %5 {offsets = [0, 1], sizes = [32, 1], strides = [1, 1]} : vector<32x2xf32> to vector<32x1xf32>
    %50 = vector.broadcast %49 : vector<32x1xf32> to vector<32x128xf32>
    %51 = arith.mulf %45, %50 : vector<32x128xf32>
    %52 = vector.shape_cast %51 : vector<32x128xf32> to vector<4x8x128xf32>
    %cst_17 = arith.constant dense<0.000000e+00> : vector<4x128xf32>
    %53 = vector.multi_reduction <add>, %52, %cst_17 [1] : vector<4x8x128xf32> to vector<4x128xf32>
    %54 = arith.addf %53, %12 : vector<4x128xf32>
    %cst_18 = arith.constant dense<0xFF800000> : vector<4xf32>
    %55 = vector.multi_reduction <maximumf>, %54, %cst_18 [1] : vector<4x128xf32> to vector<4xf32>
    %56 = vector.shape_cast %55 : vector<4xf32> to vector<4x1xf32>
    %57 = vector.broadcast %56 : vector<4x1xf32> to vector<4x128xf32>
    %58 = arith.subf %54, %57 : vector<4x128xf32>
    %59 = math.exp %58 : vector<4x128xf32>
    %cst_19 = arith.constant dense<0.000000e+00> : vector<4xf32>
    %60 = vector.multi_reduction <add>, %59, %cst_19 [1] : vector<4x128xf32> to vector<4xf32>
    %61 = vector.shape_cast %60 : vector<4xf32> to vector<4x1xf32>
    %62 = tpu.reciprocal %61 {approx = true} : vector<4x1xf32> -> vector<4x1xf32>
    %63 = vector.broadcast %62 : vector<4x1xf32> to vector<4x128xf32>
    %64 = arith.mulf %59, %63 : vector<4x128xf32>
    %65 = vector.shape_cast %64 : vector<4x128xf32> to vector<4x1x128xf32>
    %66 = vector.shape_cast %65 : vector<4x1x128xf32> to vector<4x1x128xf32>
    %67 = vector.broadcast %66 : vector<4x1x128xf32> to vector<4x8x128xf32>
    %68 = vector.shape_cast %67 : vector<4x8x128xf32> to vector<32x128xf32>
    %69 = arith.mulf %48, %68 : vector<32x128xf32>
    %cst_20 = arith.constant dense<0.000000e+00> : vector<32xf32>
    %70 = vector.multi_reduction <add>, %69, %cst_20 [1] : vector<32x128xf32> to vector<32xf32>
    %71 = vector.shape_cast %70 : vector<32xf32> to vector<32x1xf32>
    %c0_21 = arith.constant 0 : index
    %c1 = arith.constant 1 : index
    %72 = vector.load %arg8[%c0_21, %c1] : memref<32x2xf32, #tpu.memory_space<vmem>>, vector<32x1xf32>
    tpu.vector_store %arg8[%c0_21, %c1], %71 {strides = array<i32>} : memref<32x2xf32, #tpu.memory_space<vmem>>, vector<32x1xf32>,
    %c0_22 = arith.constant 0 : index
    %c0_23 = arith.constant 0 : index
    %73 = vector.load %arg8[%c0_22, %c0_23] : memref<32x2xf32, #tpu.memory_space<vmem>>, vector<32x2xf32>
    %74 = arith.truncf %73 : vector<32x2xf32> to vector<32x2xbf16>
    %c0_24 = arith.constant 0 : index
    %c0_25 = arith.constant 0 : index
    %75 = vector.load %arg5[%c0_24, %c0_25] : memref<32x32xbf16, #tpu.memory_space<vmem>>, vector<32x32xbf16>
    %cst_26 = arith.constant dense<0.000000e+00> : vector<2x32xf32>
    %76 = tpu.matmul %74, %75, %cst_26 {dimension_numbers = #tpu.dot_dimension_numbers<[0], [1], [1], [0], [0, 1, 1, 0], [], []>} : vector<32x2xbf16>, vector<32x32xbf16>, vector<2x32xf32> -> vector<2x32xf32>
    %c0_27 = arith.constant 0 : index
    %c0_28 = arith.constant 0 : index
    %77 = vector.load %arg6[%c0_27, %c0_28] : memref<1x32xf32, #tpu.memory_space<vmem>>, vector<1x32xf32>
    %78 = vector.broadcast %77 : vector<1x32xf32> to vector<2x32xf32>
    %79 = arith.addf %76, %78 : vector<2x32xf32>
    %c0_29 = arith.constant 0 : index
    %c0_30 = arith.constant 0 : index
    %c0_31 = arith.constant 0 : index
    %80 = vector.load %arg7[%c0_29, %c0_30, %c0_31] : memref<1x2x32xf32, #tpu.memory_space<vmem>>, vector<1x2x32xf32>
    %81 = vector.shape_cast %80 : vector<1x2x32xf32> to vector<2x32xf32>
    %82 = vector.shape_cast %79 : vector<2x32xf32> to vector<1x2x32xf32>
    tpu.vector_store %arg7[%c0_29, %c0_30, %c0_31], %82 {strides = array<i32>} : memref<1x2x32xf32, #tpu.memory_space<vmem>>, vector<1x2x32xf32>,
    return
  }
  func.func @transform_0(%arg0: i32) -> (i32, i32, i32) {
    %c0_i32 = arith.constant 0 : i32
    %c0_i32_0 = arith.constant 0 : i32
    %c0_i32_1 = arith.constant 0 : i32
    return %arg0, %c0_i32, %c0_i32_0 : i32, i32, i32
  }
  func.func @transform_1(%arg0: i32) -> (i32, i32, i32) {
    %c0_i32 = arith.constant 0 : i32
    %c0_i32_0 = arith.constant 0 : i32
    %c0_i32_1 = arith.constant 0 : i32
    return %arg0, %c0_i32, %c0_i32_0 : i32, i32, i32
  }
  func.func @transform_2(%arg0: i32) -> (i32, i32) {
    %c0_i32 = arith.constant 0 : i32
    %c0_i32_0 = arith.constant 0 : i32
    %c0_i32_1 = arith.constant 0 : i32
    return %c0_i32, %c0_i32_0 : i32, i32
  }
  func.func @transform_3(%arg0: i32) -> (i32, i32) {
    %c0_i32 = arith.constant 0 : i32
    %c0_i32_0 = arith.constant 0 : i32
    %c0_i32_1 = arith.constant 0 : i32
    return %c0_i32, %c0_i32_0 : i32, i32
  }
  func.func @transform_4(%arg0: i32) -> (i32, i32) {
    %c0_i32 = arith.constant 0 : i32
    %c0_i32_0 = arith.constant 0 : i32
    %c0_i32_1 = arith.constant 0 : i32
    return %c0_i32, %c0_i32_0 : i32, i32
  }
  func.func @transform_5(%arg0: i32) -> (i32, i32) {
    %c0_i32 = arith.constant 0 : i32
    %c0_i32_0 = arith.constant 0 : i32
    %c0_i32_1 = arith.constant 0 : i32
    return %c0_i32, %c0_i32_0 : i32, i32
  }
  func.func @transform_6(%arg0: i32) -> (i32, i32, i32) {
    %c0_i32 = arith.constant 0 : i32
    %c0_i32_0 = arith.constant 0 : i32
    %c0_i32_1 = arith.constant 0 : i32
    return %arg0, %c0_i32, %c0_i32_0 : i32, i32, i32
  }
}

module attributes {stable_mosaic.version = 11 : i64} {
  func.func @_attention_pool_kernel(%arg0: i32, %arg1: memref<1x32x256xbf16, #tpu.memory_space<vmem>>, %arg2: memref<1x32x2xf32, #tpu.memory_space<vmem>>, %arg3: memref<64x128xf32, #tpu.memory_space<vmem>>, %arg4: memref<64x32xbf16, #tpu.memory_space<vmem>>, %arg5: memref<32x32xbf16, #tpu.memory_space<vmem>>, %arg6: memref<1x32xf32, #tpu.memory_space<vmem>>, %arg7: memref<1x2x32xf32, #tpu.memory_space<vmem>>, %arg8: memref<32x2xf32, #tpu.memory_space<vmem>>) attributes {dimension_semantics = [#tpu.dimension_semantics<parallel>], iteration_bounds = array<i64: 1>, scalar_prefetch = 0 : i64, scratch_operands = 1 : i64, tpu.core_type = #tpu.core_type<tc>, window_params = [{transform_indices = @transform_0, window_bounds = array<i64: 1, 32, 256>}, {transform_indices = @transform_1, window_bounds = array<i64: 1, 32, 2>}, {pipeline_mode = #tpu.pipeline_mode<synchronous>, transform_indices = @transform_2, window_bounds = array<i64: 64, 128>}, {pipeline_mode = #tpu.pipeline_mode<synchronous>, transform_indices = @transform_3, window_bounds = array<i64: 64, 32>}, {pipeline_mode = #tpu.pipeline_mode<synchronous>, transform_indices = @transform_4, window_bounds = array<i64: 32, 32>}, {pipeline_mode = #tpu.pipeline_mode<synchronous>, transform_indices = @transform_5, window_bounds = array<i64: 1, 32>}, {transform_indices = @transform_6, window_bounds = array<i64: 1, 2, 32>}]} {
    %c0 = arith.constant 0 : index
    %c0_0 = arith.constant 0 : index
    %0 = vector.load %arg4[%c0, %c0_0] : memref<64x32xbf16, #tpu.memory_space<vmem>>, vector<64x32xbf16>
    %c0_1 = arith.constant 0 : index
    %c0_2 = arith.constant 0 : index
    %c0_3 = arith.constant 0 : index
    %1 = vector.load %arg1[%c0_1, %c0_2, %c0_3] : memref<1x32x256xbf16, #tpu.memory_space<vmem>>, vector<1x32x256xbf16>
    %2 = vector.shape_cast %1 : vector<1x32x256xbf16> to vector<32x256xbf16>
    %cst = arith.constant dense<0.000000e+00> : vector<64x256xf32>
    %3 = tpu.matmul %0, %2, %cst {dimension_numbers = #tpu.dot_dimension_numbers<[1], [0], [0], [1], [0, 0, 1, 1], [], []>} : vector<64x32xbf16>, vector<32x256xbf16>, vector<64x256xf32> -> vector<64x256xf32>
    %c0_4 = arith.constant 0 : index
    %c0_5 = arith.constant 0 : index
    %c0_6 = arith.constant 0 : index
    %4 = vector.load %arg2[%c0_4, %c0_5, %c0_6] : memref<1x32x2xf32, #tpu.memory_space<vmem>>, vector<1x32x2xf32>
    %5 = vector.shape_cast %4 : vector<1x32x2xf32> to vector<32x2xf32>
    %c0_7 = arith.constant 0 : index
    %c0_8 = arith.constant 0 : index
    %6 = vector.load %arg3[%c0_7, %c0_8] : memref<64x128xf32, #tpu.memory_space<vmem>>, vector<64x128xf32>
    %7 = tpu.iota {dimensions = array<i32: 1>} : vector<4x128xi32>
    %c65_i32 = arith.constant 65 : i32
    %8 = vector.broadcast %c65_i32 : i32 to vector<4x128xi32>
    %9 = arith.cmpi slt, %7, %8 : vector<4x128xi32>
    %cst_9 = arith.constant 0.000000e+00 : f32
    %cst_10 = arith.constant -1.000000e+30 : f32
    %10 = vector.broadcast %cst_9 : f32 to vector<4x128xf32>
    %11 = vector.broadcast %cst_10 : f32 to vector<4x128xf32>
    %12 = arith.select %9, %10, %11 : vector<4x128xi1>, vector<4x128xf32>
    %13 = vector.extract_strided_slice %3 {offsets = [0, 0], sizes = [32, 128], strides = [1, 1]} : vector<64x256xf32> to vector<32x128xf32>
    %14 = vector.extract_strided_slice %6 {offsets = [0, 0], sizes = [32, 128], strides = [1, 1]} : vector<64x128xf32> to vector<32x128xf32>
    %15 = arith.addf %13, %14 : vector<32x128xf32>
    %16 = vector.extract_strided_slice %3 {offsets = [32, 0], sizes = [32, 128], strides = [1, 1]} : vector<64x256xf32> to vector<32x128xf32>
    %17 = vector.extract_strided_slice %6 {offsets = [32, 0], sizes = [32, 128], strides = [1, 1]} : vector<64x128xf32> to vector<32x128xf32>
    %18 = arith.addf %16, %17 : vector<32x128xf32>
    %19 = vector.extract_strided_slice %5 {offsets = [0, 0], sizes = [32, 1], strides = [1, 1]} : vector<32x2xf32> to vector<32x1xf32>
    %20 = vector.broadcast %19 : vector<32x1xf32> to vector<32x128xf32>
    %21 = arith.mulf %15, %20 : vector<32x128xf32>
    %22 = vector.shape_cast %21 : vector<32x128xf32> to vector<4x8x128xf32>
    %cst_11 = arith.constant dense<0.000000e+00> : vector<4x128xf32>
    %23 = vector.multi_reduction <add>, %22, %cst_11 [1] : vector<4x8x128xf32> to vector<4x128xf32>
    %24 = arith.addf %23, %12 : vector<4x128xf32>
    %cst_12 = arith.constant dense<0xFF800000> : vector<4xf32>
    %25 = vector.multi_reduction <maximumf>, %24, %cst_12 [1] : vector<4x128xf32> to vector<4xf32>
    %26 = vector.shape_cast %25 : vector<4xf32> to vector<4x1xf32>
    %27 = vector.broadcast %26 : vector<4x1xf32> to vector<4x128xf32>
    %28 = arith.subf %24, %27 : vector<4x128xf32>
    %29 = math.exp %28 : vector<4x128xf32>
    %cst_13 = arith.constant dense<0.000000e+00> : vector<4xf32>
    %30 = vector.multi_reduction <add>, %29, %cst_13 [1] : vector<4x128xf32> to vector<4xf32>
    %31 = vector.shape_cast %30 : vector<4xf32> to vector<4x1xf32>
    %32 = tpu.reciprocal %31 {approx = true} : vector<4x1xf32> -> vector<4x1xf32>
    %33 = vector.broadcast %32 : vector<4x1xf32> to vector<4x128xf32>
    %34 = arith.mulf %29, %33 : vector<4x128xf32>
    %35 = vector.shape_cast %34 : vector<4x128xf32> to vector<4x1x128xf32>
    %36 = vector.shape_cast %35 : vector<4x1x128xf32> to vector<4x1x128xf32>
    %37 = vector.broadcast %36 : vector<4x1x128xf32> to vector<4x8x128xf32>
    %38 = vector.shape_cast %37 : vector<4x8x128xf32> to vector<32x128xf32>
    %39 = arith.mulf %18, %38 : vector<32x128xf32>
    %cst_14 = arith.constant dense<0.000000e+00> : vector<32xf32>
    %40 = vector.multi_reduction <add>, %39, %cst_14 [1] : vector<32x128xf32> to vector<32xf32>
    %41 = vector.shape_cast %40 : vector<32xf32> to vector<32x1xf32>
    %c0_15 = arith.constant 0 : index
    %c0_16 = arith.constant 0 : index
    %42 = vector.load %arg8[%c0_15, %c0_16] : memref<32x2xf32, #tpu.memory_space<vmem>>, vector<32x1xf32>
    tpu.vector_store %arg8[%c0_15, %c0_16], %41 {strides = array<i32>} : memref<32x2xf32, #tpu.memory_space<vmem>>, vector<32x1xf32>,
    %43 = vector.extract_strided_slice %3 {offsets = [0, 128], sizes = [32, 128], strides = [1, 1]} : vector<64x256xf32> to vector<32x128xf32>
    %44 = vector.extract_strided_slice %6 {offsets = [0, 0], sizes = [32, 128], strides = [1, 1]} : vector<64x128xf32> to vector<32x128xf32>
    %45 = arith.addf %43, %44 : vector<32x128xf32>
    %46 = vector.extract_strided_slice %3 {offsets = [32, 128], sizes = [32, 128], strides = [1, 1]} : vector<64x256xf32> to vector<32x128xf32>
    %47 = vector.extract_strided_slice %6 {offsets = [32, 0], sizes = [32, 128], strides = [1, 1]} : vector<64x128xf32> to vector<32x128xf32>
    %48 = arith.addf %46, %47 : vector<32x128xf32>
    %49 = vector.extract_strided_slice %5 {offsets = [0, 1], sizes = [32, 1], strides = [1, 1]} : vector<32x2xf32> to vector<32x1xf32>
    %50 = vector.broadcast %49 : vector<32x1xf32> to vector<32x128xf32>
    %51 = arith.mulf %45, %50 : vector<32x128xf32>
    %52 = vector.shape_cast %51 : vector<32x128xf32> to vector<4x8x128xf32>
    %cst_17 = arith.constant dense<0.000000e+00> : vector<4x128xf32>
    %53 = vector.multi_reduction <add>, %52, %cst_17 [1] : vector<4x8x128xf32> to vector<4x128xf32>
    %54 = arith.addf %53, %12 : vector<4x128xf32>
    %cst_18 = arith.constant dense<0xFF800000> : vector<4xf32>
    %55 = vector.multi_reduction <maximumf>, %54, %cst_18 [1] : vector<4x128xf32> to vector<4xf32>
    %56 = vector.shape_cast %55 : vector<4xf32> to vector<4x1xf32>
    %57 = vector.broadcast %56 : vector<4x1xf32> to vector<4x128xf32>
    %58 = arith.subf %54, %57 : vector<4x128xf32>
    %59 = math.exp %58 : vector<4x128xf32>
    %cst_19 = arith.constant dense<0.000000e+00> : vector<4xf32>
    %60 = vector.multi_reduction <add>, %59, %cst_19 [1] : vector<4x128xf32> to vector<4xf32>
    %61 = vector.shape_cast %60 : vector<4xf32> to vector<4x1xf32>
    %62 = tpu.reciprocal %61 {approx = true} : vector<4x1xf32> -> vector<4x1xf32>
    %63 = vector.broadcast %62 : vector<4x1xf32> to vector<4x128xf32>
    %64 = arith.mulf %59, %63 : vector<4x128xf32>
    %65 = vector.shape_cast %64 : vector<4x128xf32> to vector<4x1x128xf32>
    %66 = vector.shape_cast %65 : vector<4x1x128xf32> to vector<4x1x128xf32>
    %67 = vector.broadcast %66 : vector<4x1x128xf32> to vector<4x8x128xf32>
    %68 = vector.shape_cast %67 : vector<4x8x128xf32> to vector<32x128xf32>
    %69 = arith.mulf %48, %68 : vector<32x128xf32>
    %cst_20 = arith.constant dense<0.000000e+00> : vector<32xf32>
    %70 = vector.multi_reduction <add>, %69, %cst_20 [1] : vector<32x128xf32> to vector<32xf32>
    %71 = vector.shape_cast %70 : vector<32xf32> to vector<32x1xf32>
    %c0_21 = arith.constant 0 : index
    %c1 = arith.constant 1 : index
    %72 = vector.load %arg8[%c0_21, %c1] : memref<32x2xf32, #tpu.memory_space<vmem>>, vector<32x1xf32>
    tpu.vector_store %arg8[%c0_21, %c1], %71 {strides = array<i32>} : memref<32x2xf32, #tpu.memory_space<vmem>>, vector<32x1xf32>,
    %c0_22 = arith.constant 0 : index
    %c0_23 = arith.constant 0 : index
    %73 = vector.load %arg8[%c0_22, %c0_23] : memref<32x2xf32, #tpu.memory_space<vmem>>, vector<32x2xf32>
    %74 = arith.truncf %73 : vector<32x2xf32> to vector<32x2xbf16>
    %c0_24 = arith.constant 0 : index
    %c0_25 = arith.constant 0 : index
    %75 = vector.load %arg5[%c0_24, %c0_25] : memref<32x32xbf16, #tpu.memory_space<vmem>>, vector<32x32xbf16>
    %cst_26 = arith.constant dense<0.000000e+00> : vector<2x32xf32>
    %76 = tpu.matmul %74, %75, %cst_26 {dimension_numbers = #tpu.dot_dimension_numbers<[0], [1], [1], [0], [0, 1, 1, 0], [], []>} : vector<32x2xbf16>, vector<32x32xbf16>, vector<2x32xf32> -> vector<2x32xf32>
    %c0_27 = arith.constant 0 : index
    %c0_28 = arith.constant 0 : index
    %77 = vector.load %arg6[%c0_27, %c0_28] : memref<1x32xf32, #tpu.memory_space<vmem>>, vector<1x32xf32>
    %78 = vector.broadcast %77 : vector<1x32xf32> to vector<2x32xf32>
    %79 = arith.addf %76, %78 : vector<2x32xf32>
    %c0_29 = arith.constant 0 : index
    %c0_30 = arith.constant 0 : index
    %c0_31 = arith.constant 0 : index
    %80 = vector.load %arg7[%c0_29, %c0_30, %c0_31] : memref<1x2x32xf32, #tpu.memory_space<vmem>>, vector<1x2x32xf32>
    %81 = vector.shape_cast %80 : vector<1x2x32xf32> to vector<2x32xf32>
    %82 = vector.shape_cast %79 : vector<2x32xf32> to vector<1x2x32xf32>
    tpu.vector_store %arg7[%c0_29, %c0_30, %c0_31], %82 {strides = array<i32>} : memref<1x2x32xf32, #tpu.memory_space<vmem>>, vector<1x2x32xf32>,
    return
  }
  func.func @transform_0(%arg0: i32) -> (i32, i32, i32) {
    %c0_i32 = arith.constant 0 : i32
    %c0_i32_0 = arith.constant 0 : i32
    %c0_i32_1 = arith.constant 0 : i32
    return %arg0, %c0_i32, %c0_i32_0 : i32, i32, i32
  }
  func.func @transform_1(%arg0: i32) -> (i32, i32, i32) {
    %c0_i32 = arith.constant 0 : i32
    %c0_i32_0 = arith.constant 0 : i32
    %c0_i32_1 = arith.constant 0 : i32
    return %arg0, %c0_i32, %c0_i32_0 : i32, i32, i32
  }
  func.func @transform_2(%arg0: i32) -> (i32, i32) {
    %c0_i32 = arith.constant 0 : i32
    %c0_i32_0 = arith.constant 0 : i32
    %c0_i32_1 = arith.constant 0 : i32
    return %c0_i32, %c0_i32_0 : i32, i32
  }
  func.func @transform_3(%arg0: i32) -> (i32, i32) {
    %c0_i32 = arith.constant 0 : i32
    %c0_i32_0 = arith.constant 0 : i32
    %c0_i32_1 = arith.constant 0 : i32
    return %c0_i32, %c0_i32_0 : i32, i32
  }
  func.func @transform_4(%arg0: i32) -> (i32, i32) {
    %c0_i32 = arith.constant 0 : i32
    %c0_i32_0 = arith.constant 0 : i32
    %c0_i32_1 = arith.constant 0 : i32
    return %c0_i32, %c0_i32_0 : i32, i32
  }
  func.func @transform_5(%arg0: i32) -> (i32, i32) {
    %c0_i32 = arith.constant 0 : i32
    %c0_i32_0 = arith.constant 0 : i32
    %c0_i32_1 = arith.constant 0 : i32
    return %c0_i32, %c0_i32_0 : i32, i32
  }
  func.func @transform_6(%arg0: i32) -> (i32, i32, i32) {
    %c0_i32 = arith.constant 0 : i32
    %c0_i32_0 = arith.constant 0 : i32
    %c0_i32_1 = arith.constant 0 : i32
    return %arg0, %c0_i32, %c0_i32_0 : i32, i32, i32
  }
}

</mosaic_0001>

<bundles_post_ra>
// kernel: tpu_custom_call.1
= control target key start
LH: loop header
LB: loop body
LE: loop exit
PB: predicated region body
PF: predicated region fallthrough
CT: control target
= control target key end

     0   :  { %11 = vsyncpa [#allocation4], 0  ;;  %s900_s0 = inlined_call_operand.hbm [shape: bf16[1,32,256], index: 0, kind: input, shape index: {}]   ;;  %s901_s1 = inlined_call_operand.vmem [shape: f32[1,32,2], index: 1, kind: input, shape index: {}]   ;;  %s902_s2 = inlined_call_operand.vmem [shape: f32[64,128], index: 2, kind: input, shape index: {}]   ;;  %s903_s3 = inlined_call_operand.vmem [shape: bf16[64,32], index: 3, kind: input, shape index: {}]   ;;  %s904_s4 = inlined_call_operand.hbm [shape: bf16[32,32], index: 4, kind: input, shape index: {}]   ;;  %s905_s5 = inlined_call_operand.vmem [shape: f32[1,32], index: 5, kind: input, shape index: {}]   ;;  %s906_s6 = inlined_call_operand.hbm [shape: f32[1,2,32], index: 6, kind: output, shape index: {}]  }
   0x1   :  { %12 = vsyncpa [#allocation7], 0 }
   0x2   :  { %13 = vsyncpa [#allocation5], 0  ;;  %s767_s21 = smov [#allocation3]  }
   0x3   :  { %s19_s22 = sshll.u32 %s767_s21, 4  ;;  %s20_s22 = int_to_ptr.vmem [resolvable:$true] %s19_s22 }
   0x4   :  { %s709_s23 = scalar_lea.vmem %s20_s22, 512  ;;  %p714_p1 = scmp.lt.s32.totalorder %s20_s22, %s20_s22 }
   0x5   :  { %p710_p0 = scmp.ne.s32.totalorder %s20_s22, %s709_s23  ;;  %p715_p2 = scmp.lt.s32.totalorder %s709_s23, %s709_s23 }
   0x7   :  { %p716_p3 = por %p715_p2, %p714_p1 }
   0x9   :  { %p717_p4 = pnand %p716_p3, %p710_p0 }
   0xb   :  { %720 = shalt.err (!%p717_p4)
}
   0xc   :  { %s768_s24 = smov 128   ;;  %s769_s25 = smov 8  }
   0xd   :  { %25 = dma.hbm_to_vmem [thread:$0]  %s900_s0, 512, %s20_s22, [#allocation4], %s768_s24, %s768_s24, %s769_s25  }
   0xe   :  { %s770_s28 = smov [#allocation6]  }
   0xf   :  { %s37_s29 = sshll.u32 %s770_s28, 4  ;;  %s38_s29 = int_to_ptr.vmem [resolvable:$true] %s37_s29 }
  0x10   :  { %s729_s30 = scalar_lea.vmem %s38_s29, 256  ;;  %p734_p6 = scmp.lt.s32.totalorder %s38_s29, %s38_s29 }
  0x11   :  { %p730_p5 = scmp.ne.s32.totalorder %s38_s29, %s729_s30  ;;  %p735_p7 = scmp.lt.s32.totalorder %s729_s30, %s729_s30 }
  0x13   :  { %p736_p8 = por %p735_p7, %p734_p6 }
  0x15   :  { %p737_p9 = pnand %p736_p8, %p730_p5 }
  0x17   :  { %740 = shalt.err (!%p737_p9)
}
  0x18   :  { %s771_s7 = smov 64   ;;  %s772_s8 = smov 4  }
  0x19   :  { %43 = dma.hbm_to_vmem [thread:$0]  %s904_s4, 256, %s38_s29, [#allocation7], %s771_s7, %s771_s7, %s772_s8  }
  0x1a   :  { %761 = dma.done.wait [#allocation4], 512  }
  0x1b   :  { %762 = vsyncadd [#allocation4], 4294966784 }
  0x1c   :  { %763 = dma.done.wait [#allocation7], 256  }
  0x1d   :  { %764 = vsyncadd [#allocation7], 4294967040  ;;  %v773_v0 = vmov 0   ;;  %v774_v1 = vmov 1   ;;  %v669_v2 = vld [vmem:[#allocation3 + $0x14] ss:$8 sps:$4 sm:$0xff]   ;;  %v203_v37 = vlaneseq }
  0x1e   :  { %150 = vmatprep.mubr.bf16.mxu0 %v773_v0  ;;  %664 = vset.pattern.permute.xlu0 %v773_v0  ;;  %v671_v3 = vld [vmem:[#allocation3 + $0x10] ss:$8 sps:$4 sm:$0xff]   ;;  %v672_v4 = vld [vmem:[#allocation3 + $0x4] ss:$8 sps:$4 sm:$0xff]   ;;  %v674_v5 = vld [vmem:[#allocation3] ss:$8 sps:$4 sm:$0xff]  }
  0x1f   :  { %665 = vset.pattern.permute.xlu1 %v774_v1  ;;  %130 = vmatprep.subr.bf16.mxu0 %v669_v2  ;;  %v192_v6 = vld [vmem:[%s901_s1 + $0x8] sm:$0xff]  ;;  %v675_v7 = vld [vmem:[%s903_s3] sm:$0xff]   ;;  %vm105_vm0 = vcmask 261120   ;;  %v193_v8 = vld [vmem:[%s901_s1 + $0x10] sm:$0xff]  ;;  %v204_v51 = vand.u32 127, %v203_v37  ;;  %vm272_vm2 = vcmask 1041409  }
  0x20   :  { %131 = vmatpush1.bf16.msra.mxu0 %v671_v3  ;;  %222 = vperm.xlu0 %664, %v192_v6   ;;  %v191_v9 = vld [vmem:[%s901_s1] sm:$0xff]  ;;  %v194_v10 = vld [vmem:[%s901_s1 + $0x18] sm:$0xff]  ;;  %v676_v11 = vld [vmem:[%s903_s3 + $0x8] sm:$0xff]   ;;  %vm275_vm3 = vcmask 1042434   ;;  %vm278_vm4 = vcmask 1043459   ;;  %vm281_vm5 = vcmask 1043456  }
  0x21   :  { %132 = vmatprep.subr.bf16.mxu0 %v672_v4  ;;  %378 = vperm.xlu1 %665, %v192_v6   ;;  %v677_v12 = vld [vmem:[%s903_s3 + $0x10] sm:$0xff]   ;;  %v678_v13 = vld [vmem:[%s903_s3 + $0x18] sm:$0xff]   ;;  %v195_v18 = vld [vmem:[%s902_s2] sm:$0xff]  ;;  %vm205_vm1 = vcmp.lt.s32.totalorder %v204_v51, 65  ;;  %vm777_vm6 = vmmov 0   ;;  %vm360_vm7 = vcmask 7168  }
  0x22   :  { %v196_v24 = vld [vmem:[%s902_s2 + $0x8] sm:$0xff]  ;;  %v197_v35 = vld [vmem:[%s902_s2 + $0x10] sm:$0xff]  ;;  %v198_v47 = vld [vmem:[%s902_s2 + $0x18] sm:$0xff]  ;;  %vm510_vm8 = vcmask 15368   ;;  %s778_s14 = smov [#allocation8]   ;;  %vm607_vm9 = vcmask 254976  }
  0x23   :  { %s615_s15 = sshll.u32 %s778_s14, 4  ;;  %s616_s15 = int_to_ptr.vmem [resolvable:$true] %s615_s15 }
  0x24   :  { %133 = vmatpush1.bf16.msra.mxu0 %v674_v5  ;;  %227 = vperm.xlu0 %664, %v193_v8   ;;  %s741_s16 = scalar_lea.vmem %s616_s15, 32  ;;  %p746_p11 = scmp.lt.s32.totalorder %s616_s15, %s616_s15 }
  0x25   :  { %666 = vset.pattern.permute.xlu1 %v773_v0  ;;  %p742_p10 = scmp.ne.s32.totalorder %s616_s15, %s741_s16  ;;  %p747_p12 = scmp.lt.s32.totalorder %s741_s16, %s741_s16 }
  0x26   :  { %217 = vperm.xlu1 %666, %v191_v9  }
  0x27   :  { %633 = vmatmul.mubr.msk.bf16.vlgmr.msra.gmra.mxu0 %vm105_vm0, %v675_v7  ;;  %p748_p13 = por %p747_p12, %p746_p11 }
  0x28   :  { %160 = vmatprep.mubr.bf16.mxu0 %v773_v0  ;;  %232 = vperm.xlu0 %664, %v194_v10  }
  0x29   :  { %p749_p0 = pnand %p748_p13, %p742_p10 }
  0x2a   :  { %667 = vset.pattern.permute.xlu1 %v774_v1 }
  0x2b   :  { %382 = vperm.xlu1 %667, %v193_v8  }
  0x2c   :  { %668 = vset.pattern.permute.xlu0 %v774_v1 }
  0x2d   :  { %374 = vperm.xlu0 %668, %v191_v9  }
  0x2f   :  { %634 = vmatmul.mubr.msk.bf16.gmra.mxu0 %vm105_vm0, %v676_v11  ;;  %386 = vperm.xlu1 %667, %v194_v10  }
  0x30   :  { %170 = vmatprep.mubr.bf16.mxu0 %v773_v0 }
  0x37   :  { %635 = vmatmul.mubr.msk.bf16.gmra.mxu0 %vm105_vm0, %v677_v12 }
  0x38   :  { %180 = vmatprep.mubr.bf16.mxu0 %v773_v0 }
  0x3f   :  { %636 = vmatmul.mubr.msk.bf16.gmra.mxu0 %vm105_vm0, %v678_v13 }
  0x9b   :  { %v223_v14 = vpop.permute.xlu0 %222 }
  0x9c   :  { %v379_v16 = vpop.permute.xlu1 %378 }
  0x9f   :  { %v228_v15 = vpop.permute.xlu0 %227 }
  0xa1   :  { %v218_v20 = vpop.permute.xlu1 %217 }
  0xa3   :  { %v233_v17 = vpop.permute.xlu0 %232 }
  0xa6   :  { %v383_v41 = vpop.permute.xlu1 %382 }
  0xa8   :  { %v375_v23 = vpop.permute.xlu0 %374 }
  0xaa   :  { %v387_v62 = vpop.permute.xlu1 %386 }
  0xe7   :  { %v152_v19 = vpop.f32.mrf.mxu0 }
  0xe8   :  { %v207_v21 = vadd.f32 %v195_v18, %v152_v19 }
  0xe9   :  { %v154_v22 = vpop.f32.mrf.mxu0 }
  0xea   :  { %v235_v25 = vmul.f32 %v218_v20, %v207_v21  ;;  %v365_v26 = vadd.f32 %v195_v18, %v154_v22  ;;  %v775_v18 = vmov -1e+30  }
  0xeb   :  { %v156_v27 = vpop.f32.mrf.mxu0  ;;  %v206_v19 = vsel %vm205_vm1, 0.0, %v775_v18 }
  0xec   :  { %v239_v28 = vrot.slane %v235_v25, 4  ;;  %v389_v29 = vmul.f32 %v375_v23, %v365_v26  ;;  %v208_v30 = vadd.f32 %v196_v24, %v156_v27 }
  0xed   :  { %v158_v31 = vpop.f32.mrf.mxu0 }
  0xee   :  { %v393_v32 = vrot.slane %v389_v29, 4  ;;  %v236_v33 = vmul.f32 %v223_v14, %v208_v30  ;;  %v366_v34 = vadd.f32 %v196_v24, %v158_v31  ;;  %v240_v38 = vadd.f32 %v239_v28, %v235_v25 }
  0xef   :  { %v162_v36 = vpop.f32.mrf.mxu0 }
  0xf0   :  { %v245_v39 = vrot.slane %v236_v33, 4  ;;  %v390_v40 = vmul.f32 %v379_v16, %v366_v34  ;;  %v209_v42 = vadd.f32 %v197_v35, %v162_v36  ;;  %v394_v44 = vadd.f32 %v393_v32, %v389_v29 }
  0xf1   :  { %v164_v43 = vpop.f32.mrf.mxu0  ;;  %v241_v52 = vrot.slane %v240_v38, 2 }
  0xf2   :  { %v246_v45 = vadd.f32 %v245_v39, %v236_v33  ;;  %v399_v46 = vrot.slane %v390_v40, 4  ;;  %v237_v48 = vmul.f32 %v228_v15, %v209_v42  ;;  %v367_v49 = vadd.f32 %v197_v35, %v164_v43 }
  0xf3   :  { %v166_v50 = vpop.f32.mrf.mxu0  ;;  %v395_v59 = vrot.slane %v394_v44, 2  ;;  %v242_v3 = vadd.f32 %v241_v52, %v240_v38 }
  0xf4   :  { %v247_v53 = vrot.slane %v246_v45, 2  ;;  %v400_v54 = vadd.f32 %v399_v46, %v390_v40  ;;  %v251_v55 = vrot.slane %v237_v48, 4  ;;  %v391_v56 = vmul.f32 %v383_v41, %v367_v49 }
  0xf5   :  { %v210_v57 = vadd.f32 %v198_v47, %v166_v50  ;;  %v168_v58 = vpop.f32.mrf.mxu0  ;;  %v396_v10 = vadd.f32 %v395_v59, %v394_v44 }
  0xf6   :  { %v248_v60 = vadd.f32 %v247_v53, %v246_v45  ;;  %v401_v61 = vrot.slane %v400_v54, 2  ;;  %v252_v63 = vadd.f32 %v251_v55, %v237_v48  ;;  %v405_v0 = vrot.slane %v391_v56, 4 }
  0xf7   :  { %v238_v1 = vmul.f32 %v233_v17, %v210_v57  ;;  %v368_v2 = vadd.f32 %v198_v47, %v168_v58  ;;  %v243_v17 = vrot.slane %v242_v3, 1  ;;  %v397_v25 = vrot.slane %v396_v10, 1 }
  0xf8   :  { %v249_v4 = vrot.slane %v248_v60, 1  ;;  %v402_v5 = vadd.f32 %v401_v61, %v400_v54  ;;  %v253_v6 = vrot.slane %v252_v63, 2  ;;  %v406_v7 = vadd.f32 %v405_v0, %v391_v56 }
  0xf9   :  { %v257_v8 = vrot.slane %v238_v1, 4  ;;  %v392_v9 = vmul.f32 %v387_v62, %v368_v2  ;;  %v244_v31 = vadd.f32 %v243_v17, %v242_v3  ;;  %v398_v38 = vadd.f32 %v397_v25, %v396_v10 }
  0xfa   :  { %v250_v11 = vadd.f32 %v249_v4, %v248_v60  ;;  %v403_v12 = vrot.slane %v402_v5, 1  ;;  %v254_v13 = vadd.f32 %v253_v6, %v252_v63  ;;  %v407_v14 = vrot.slane %v406_v7, 2 }
  0xfb   :  { %v258_v15 = vadd.f32 %v257_v8, %v238_v1  ;;  %v411_v16 = vrot.slane %v392_v9, 4  ;;  %v263_v44 = vadd.f32 %v244_v31, %v206_v19  ;;  %v417_v49 = vadd.f32 %v398_v38, %v206_v19 }
  0xfc   :  { %v404_v20 = vadd.f32 %v403_v12, %v402_v5  ;;  %v255_v21 = vrot.slane %v254_v13, 1  ;;  %v408_v22 = vadd.f32 %v407_v14, %v406_v7  ;;  %v264_v26 = vadd.f32 %v250_v11, %v206_v19 }
  0xfd   :  { %v259_v23 = vrot.slane %v258_v15, 2  ;;  %v412_v24 = vadd.f32 %v411_v16, %v392_v9 }
  0xfe   :  { %v256_v27 = vadd.f32 %v255_v21, %v254_v13  ;;  %v409_v28 = vrot.slane %v408_v22, 1  ;;  %v418_v32 = vadd.f32 %v404_v20, %v206_v19  ;;  %v271_v42 = vrot.slane %v264_v26, 7 }
  0xff   :  { %v260_v29 = vadd.f32 %v259_v23, %v258_v15  ;;  %v413_v30 = vrot.slane %v412_v24, 2 }
 0x100   :  { %v410_v33 = vadd.f32 %v409_v28, %v408_v22  ;;  %v265_v36 = vadd.f32 %v256_v27, %v206_v19  ;;  %v425_v47 = vrot.slane %v418_v32, 7  ;;  %v273_v50 = vsel %vm272_vm2, %v271_v42, %v263_v44 }
 0x101   :  { %v261_v34 = vrot.slane %v260_v29, 1  ;;  %v414_v35 = vadd.f32 %v413_v30, %v412_v24 }
 0x102   :  { %v419_v39 = vadd.f32 %v410_v33, %v206_v19  ;;  %v274_v43 = vrot.slane %v265_v36, 6  ;;  %v426_v55 = vsel %vm272_vm2, %v425_v47, %v417_v49 }
 0x103   :  { %v262_v40 = vadd.f32 %v261_v34, %v260_v29  ;;  %v415_v41 = vrot.slane %v414_v35, 1 }
 0x104   :  { %v427_v48 = vrot.slane %v419_v39, 6  ;;  %v276_v53 = vsel %vm275_vm3, %v274_v43, %v273_v50  ;;  %v333_v50 = vshrl.u32 %v203_v37, 7  ;;  %v202_v37 = vld [vmem:[%s902_s2 + $0x38] sm:$0xff] }
 0x105   :  { %v416_v45 = vadd.f32 %v415_v41, %v414_v35  ;;  %v266_v46 = vadd.f32 %v262_v40, %v206_v19 }
 0x106   :  { %v428_v58 = vsel %vm275_vm3, %v427_v48, %v426_v55  ;;  %v200_v55 = vld [vmem:[%s902_s2 + $0x28] sm:$0xff] }
 0x107   :  { %v277_v51 = vrot.slane %v266_v46, 5  ;;  %v420_v52 = vadd.f32 %v416_v45, %v206_v19 }
 0x109   :  { %v279_v54 = vsel %vm278_vm4, %v277_v51, %v276_v53  ;;  %v429_v56 = vrot.slane %v420_v52, 5 }
 0x10a   :  { %v282_v57 = vsel %vm281_vm5, %v279_v54, -inf  ;;  %v199_v54 = vld [vmem:[%s902_s2 + $0x20] sm:$0xff] }
 0x10b   :  { %283 = vmax.xlane.f32.xlu1 %v282_v57  ;;  %v430_v59 = vsel %vm278_vm4, %v429_v56, %v428_v58 }
 0x10c   :  { %v432_v60 = vsel %vm281_vm5, %v430_v59, -inf }
 0x10d   :  { %433 = vmax.xlane.f32.xlu0 %v432_v60 }
 0x194   :  { %v284_v61 = vpop.xlane.xlu1 %283 }
 0x195   :  { %v286_v62 = vrot.slane %v284_v61, 1  ;;  %v287_v63 = vrot.slane %v284_v61, 2  ;;  %v288_v0 = vrot.slane %v284_v61, 3  ;;  %v293_v1 = vsub.f32 %v263_v44, %v284_v61  ;;  %v172_v44 = vpop.f32.mrf.mxu0 }
 0x196   :  { %v434_v2 = vpop.xlane.xlu0 %433  ;;  %v211_v61 = vadd.f32 %v199_v54, %v172_v44 }
 0x197   :  { %v294_v3 = vsub.f32 %v264_v26, %v286_v62  ;;  %v295_v4 = vsub.f32 %v265_v36, %v287_v63  ;;  %v296_v5 = vsub.f32 %v266_v46, %v288_v0  ;;  %v297_v6 = vmul.f32 1.442695, %v293_v1  ;;  %v174_v45 = vpop.f32.mrf.mxu0 }
 0x198   :  { %v436_v7 = vrot.slane %v434_v2, 1  ;;  %v437_v8 = vrot.slane %v434_v2, 2  ;;  %v438_v9 = vrot.slane %v434_v2, 3  ;;  %v443_v10 = vsub.f32 %v417_v49, %v434_v2 }
 0x199   :  { %681 = vpow2.f32 %v297_v6  ;;  %v299_v11 = vmul.f32 1.442695, %v294_v3  ;;  %v301_v12 = vmul.f32 1.442695, %v295_v4  ;;  %v303_v13 = vmul.f32 1.442695, %v296_v5  ;;  %v176_v47 = vpop.f32.mrf.mxu0 }
 0x19a   :  { %v444_v14 = vsub.f32 %v418_v32, %v436_v7  ;;  %v445_v15 = vsub.f32 %v419_v39, %v437_v8  ;;  %v446_v16 = vsub.f32 %v420_v52, %v438_v9  ;;  %v447_v18 = vmul.f32 1.442695, %v443_v10  ;;  %v201_v9 = vld [vmem:[%s902_s2 + $0x30] sm:$0xff] }
 0x19b   :  { %683 = vpow2.f32 %v299_v11  ;;  %v178_v49 = vpop.f32.mrf.mxu0  ;;  %v334_v52 = vsub.s32 0, %v333_v50  ;;  %v212_v2 = vadd.f32 %v200_v55, %v176_v47  ;;  %v369_v8 = vadd.f32 %v199_v54, %v174_v45 }
 0x19c   :  { %685 = vpow2.f32 %v301_v12  ;;  %v449_v19 = vmul.f32 1.442695, %v444_v14  ;;  %v451_v17 = vmul.f32 1.442695, %v445_v15  ;;  %v453_v20 = vmul.f32 1.442695, %v446_v16 }
 0x19d   :  { %687 = vpow2.f32 %v303_v13  ;;  %v182_v51 = vpop.f32.mrf.mxu0 }
 0x19e   :  { %689 = vpow2.f32 %v447_v18 }
 0x19f   :  { %691 = vpow2.f32 %v449_v19  ;;  %v184_v56 = vpop.f32.mrf.mxu0  ;;  %v213_v19 = vadd.f32 %v201_v9, %v182_v51 }
 0x1a0   :  { %693 = vpow2.f32 %v451_v17 }
 0x1a1   :  { %695 = vpow2.f32 %v453_v20  ;;  %v186_v3 = vpop.f32.mrf.mxu0 }
 0x1a2   :  { %v214_v10 = vadd.f32 %v202_v37, %v186_v3 }
 0x1a6   :  { %v682_v21 = vpop.eup %681 }
 0x1a8   :  { %v684_v22 = vpop.eup %683 }
 0x1a9   :  { %v686_v23 = vpop.eup %685  ;;  %v309_v24 = vrot.slane %v684_v22, 7 }
 0x1aa   :  { %v688_v25 = vpop.eup %687  ;;  %v311_v26 = vrot.slane %v686_v23, 6 }
 0x1ab   :  { %v690_v27 = vpop.eup %689  ;;  %v310_v28 = vsel %vm272_vm2, %v309_v24, %v682_v21  ;;  %v313_v29 = vrot.slane %v688_v25, 5 }
 0x1ac   :  { %v692_v30 = vpop.eup %691  ;;  %v312_v31 = vsel %vm275_vm3, %v311_v26, %v310_v28  ;;  %v188_v28 = vpop.f32.mrf.mxu0 }
 0x1ad   :  { %v694_v32 = vpop.eup %693  ;;  %v314_v33 = vsel %vm278_vm4, %v313_v29, %v312_v31  ;;  %v459_v34 = vrot.slane %v692_v30, 7  ;;  %v371_v29 = vadd.f32 %v201_v9, %v184_v56  ;;  %v637_v56 = vld [vmem:[%s905_s5] ss:$0 sm:$0xff] }
 0x1ae   :  { %v696_v35 = vpop.eup %695  ;;  %v316_v36 = vsel %vm281_vm5, %v314_v33, 0.0  ;;  %v461_v38 = vrot.slane %v694_v32, 6 }
 0x1af   :  { %317 = vadd.xlane.f32.xlu0 %v316_v36  ;;  %v460_v39 = vsel %vm272_vm2, %v459_v34, %v690_v27  ;;  %v463_v40 = vrot.slane %v696_v35, 5  ;;  %v372_v34 = vadd.f32 %v202_v37, %v188_v28 }
 0x1b0   :  { %v462_v41 = vsel %vm275_vm3, %v461_v38, %v460_v39  ;;  %v776_v38 = vmov 0.0   ;;  %v680_v39 = vld [vmem:[#allocation6] sm:$0xff]  }
 0x1b1   :  { %v464_v42 = vsel %vm278_vm4, %v463_v40, %v462_v41  ;;  %644 = vmatprep.subr.bf16.mxu1 %v776_v38  ;;  %648 = vmatprep.mubr.msk.bf16.mxu1 %vm777_vm6, %v776_v38  ;;  %v562_v40 = vsel %vm105_vm0, %v680_v39, 0 }
 0x1b2   :  { %v466_v43 = vsel %vm281_vm5, %v464_v42, 0.0 }
 0x1b3   :  { %467 = vadd.xlane.f32.xlu1 %v466_v43 }
 0x238   :  { %v318_v46 = vpop.xlane.xlu0 %317 }
 0x239   :  { %697 = vrcp.f32 %v318_v46 }
 0x23c   :  { %v468_v48 = vpop.xlane.xlu1 %467 }
 0x23d   :  { %699 = vrcp.f32 %v468_v48 }
 0x246   :  { %v698_v53 = vpop.eup %697 }
 0x247   :  { %v328_v57 = vmul.f32 %v698_v53, %v682_v21  ;;  %v321_v58 = vrot.slane %v698_v53, 1  ;;  %v323_v59 = vrot.slane %v698_v53, 3  ;;  %v322_v60 = vrot.slane %v698_v53, 2 }
 0x249   :  { %v335_v62 = vrot.slane %v328_v57, %v334_v52  ;;  %v329_v63 = vmul.f32 %v684_v22, %v321_v58  ;;  %v331_v0 = vmul.f32 %v688_v25, %v323_v59  ;;  %v330_v7 = vmul.f32 %v686_v23, %v322_v60 }
 0x24a   :  { %v700_v1 = vpop.eup %699  ;;  %v370_v25 = vadd.f32 %v200_v55, %v178_v49 }
 0x24b   :  { %v348_v4 = vmul.f32 %v335_v62, %v211_v61  ;;  %v339_v5 = vrot.slane %v329_v63, %v334_v52  ;;  %v478_v6 = vmul.f32 %v700_v1, %v690_v27  ;;  %v471_v11 = vrot.slane %v700_v1, 1 }
 0x24c   :  { %v472_v12 = vrot.slane %v700_v1, 2  ;;  %v347_v15 = vrot.slane %v331_v0, %v334_v52  ;;  %v473_v16 = vrot.slane %v700_v1, 3  ;;  %v343_v20 = vrot.slane %v330_v7, %v334_v52 }
 0x24d   :  { %352 = vadd.xlane.f32.xlu0 %v348_v4  ;;  %v349_v13 = vmul.f32 %v339_v5, %v212_v2  ;;  %v485_v14 = vrot.slane %v478_v6, %v334_v52  ;;  %v479_v18 = vmul.f32 %v692_v30, %v471_v11 }
 0x24e   :  { %v480_v21 = vmul.f32 %v694_v32, %v472_v12  ;;  %v351_v22 = vmul.f32 %v347_v15, %v214_v10  ;;  %v481_v24 = vmul.f32 %v696_v35, %v473_v16  ;;  %v350_v26 = vmul.f32 %v343_v20, %v213_v19  ;;  %v679_v32 = vld [vmem:[#allocation6 + $0x8] sm:$0xff]  }
 0x24f   :  { %354 = vadd.xlane.f32.xlu1 %v349_v13  ;;  %v498_v17 = vmul.f32 %v485_v14, %v369_v8  ;;  %v489_v23 = vrot.slane %v479_v18, %v334_v52  ;;  %v565_v35 = vsel %vm105_vm0, %v679_v32, 0 }
 0x250   :  { %v493_v27 = vrot.slane %v480_v21, %v334_v52  ;;  %v497_v33 = vrot.slane %v481_v24, %v334_v52  ;;  %645 = vmatpush3.bf16.xpose.msra.mxu1 %v565_v35 }
 0x251   :  { %502 = vadd.xlane.f32.xlu0 %v498_v17  ;;  %v499_v31 = vmul.f32 %v489_v23, %v370_v25  ;;  %646 = vmatprep.subr.bf16.mxu1 %v776_v38 }
 0x252   :  { %v500_v30 = vmul.f32 %v493_v27, %v371_v29  ;;  %v501_v36 = vmul.f32 %v497_v33, %v372_v34 }
 0x253   :  { %358 = vadd.xlane.f32.xlu1 %v351_v22 }
 0x255   :  { %356 = vadd.xlane.f32.xlu0 %v350_v26 }
 0x257   :  { %504 = vadd.xlane.f32.xlu1 %v499_v31 }
 0x258   :  { %647 = vmatpush3.bf16.xpose.msra.mxu1 %v562_v40 }
 0x259   :  { %506 = vadd.xlane.f32.xlu0 %v500_v30 }
 0x25b   :  { %508 = vadd.xlane.f32.xlu1 %v501_v36 }
 0x2d6   :  { %v353_v41 = vpop.xlane.xlu0 %352 }
 0x2d7   :  { %361 = vst.msk [vmem:[#allocation2] sm:$0xff] %vm360_vm7, %v353_v41 }
 0x2d8   :  { %v355_v42 = vpop.xlane.xlu1 %354 }
 0x2d9   :  { %362 = vst.msk [vmem:[#allocation2 + $0x8] sm:$0xff] %vm360_vm7, %v355_v42 }
 0x2da   :  { %v503_v43 = vpop.xlane.xlu0 %502 }
 0x2db   :  { %511 = vst.msk [vmem:[#allocation2] sm:$0xff] %vm510_vm8, %v503_v43 }
 0x2dc   :  { %v359_v44 = vpop.xlane.xlu1 %358 }
 0x2dd   :  { %364 = vst.msk [vmem:[#allocation2 + $0x18] sm:$0xff] %vm360_vm7, %v359_v44 }
 0x2de   :  { %v357_v45 = vpop.xlane.xlu0 %356 }
 0x2df   :  { %363 = vst.msk [vmem:[#allocation2 + $0x10] sm:$0xff] %vm360_vm7, %v357_v45 }
 0x2e0   :  { %v505_v46 = vpop.xlane.xlu1 %504 }
 0x2e1   :  { %512 = vst.msk [vmem:[#allocation2 + $0x8] sm:$0xff] %vm510_vm8, %v505_v46 }
 0x2e2   :  { %v507_v47 = vpop.xlane.xlu0 %506  ;;  %v515_v49 = vld [vmem:[#allocation2] sm:$0xff] }
 0x2e3   :  { %513 = vst.msk [vmem:[#allocation2 + $0x10] sm:$0xff] %vm510_vm8, %v507_v47 }
 0x2e4   :  { %v509_v48 = vpop.xlane.xlu1 %508 }
 0x2e5   :  { %514 = vst.msk [vmem:[#allocation2 + $0x18] sm:$0xff] %vm510_vm8, %v509_v48 }
 0x2e8   :  { %v516_v50 = vld [vmem:[#allocation2 + $0x8] sm:$0xff] }
 0x2e9   :  { %v519_v51 = vpack.c.bf16 %v516_v50, %v515_v49 }
 0x2ea   :  { %v517_v52 = vld [vmem:[#allocation2 + $0x10] sm:$0xff] }
 0x2eb   :  { %532 = vxpose.xlu0.c.b16.start [1/2] (short) (narrow) %v519_v51, 16 }
 0x2ec   :  { %v518_v53 = vld [vmem:[#allocation2 + $0x18] sm:$0xff] }
 0x2ed   :  { %v520_v54 = vpack.c.bf16 %v518_v53, %v517_v52 }
 0x2ef   :  { %533 = vxpose.xlu0.c.b16.end [2/2] (short) (narrow) %v520_v54, 16 }
 0x34d   :  { %v540_v55 = vpop.trf.xlu0 }
 0x34e   :  { %649 = vmatmul.mubr.msk.bf16.vlgmr.msra.gmra.mxu1 %vm105_vm0, %v540_v55 }
 0x40e   :  { %v601_v57 = vpop.f32.mrf.mxu1 }
 0x40f   :  { %v602_v58 = vadd.f32 %v637_v56, %v601_v57 }
 0x410   :  { %v650_v59 = vpop.f32.mrf.mxu1 }
 0x411   :  { %608 = vst.msk [vmem:[#allocation8] sm:$0x3] %vm607_vm9, %v602_v58 }
 0x412   :  { %v604_v60 = vpop.f32.mrf.mxu1 }
 0x413   :  { %752 = shalt.err (!%p749_p0)
}
 0x414   :  { %618 = dma.vmem_to_hbm [thread:$0]  %s616_s15, 32, %s906_s6, [#allocation5]   ;;  %v651_v61 = vpop.f32.mrf.mxu1 }
 0x415   :  { %765 = dma.done.wait [#allocation5], 32  }
 0x416   :  { %766 = vsyncadd [#allocation5], 4294967264 }
 0x417   :  { %622 = vsyncpa [#allocation4], 1 }
 0x418   :  { %623 = vsyncpa [#allocation7], 1 }
 0x419   :  { %624 = vsyncpa [#allocation5], 1 }

// kernel: tpu_custom_call.1
= control target key start
LH: loop header
LB: loop body
LE: loop exit
PB: predicated region body
PF: predicated region fallthrough
CT: control target
= control target key end

     0   :  { %11 = vsyncpa [#allocation4], 0  ;;  %s900_s0 = inlined_call_operand.hbm [shape: bf16[1,32,256], index: 0, kind: input, shape index: {}]   ;;  %s901_s1 = inlined_call_operand.vmem [shape: f32[1,32,2], index: 1, kind: input, shape index: {}]   ;;  %s902_s2 = inlined_call_operand.vmem [shape: f32[64,128], index: 2, kind: input, shape index: {}]   ;;  %s903_s3 = inlined_call_operand.vmem [shape: bf16[64,32], index: 3, kind: input, shape index: {}]   ;;  %s904_s4 = inlined_call_operand.hbm [shape: bf16[32,32], index: 4, kind: input, shape index: {}]   ;;  %s905_s5 = inlined_call_operand.vmem [shape: f32[1,32], index: 5, kind: input, shape index: {}]   ;;  %s906_s6 = inlined_call_operand.hbm [shape: f32[1,2,32], index: 6, kind: output, shape index: {}]  }
   0x1   :  { %12 = vsyncpa [#allocation7], 0 }
   0x2   :  { %13 = vsyncpa [#allocation5], 0  ;;  %s767_s21 = smov [#allocation3]  }
   0x3   :  { %s19_s22 = sshll.u32 %s767_s21, 4  ;;  %s20_s22 = int_to_ptr.vmem [resolvable:$true] %s19_s22 }
   0x4   :  { %s709_s23 = scalar_lea.vmem %s20_s22, 512  ;;  %p714_p1 = scmp.lt.s32.totalorder %s20_s22, %s20_s22 }
   0x5   :  { %p710_p0 = scmp.ne.s32.totalorder %s20_s22, %s709_s23  ;;  %p715_p2 = scmp.lt.s32.totalorder %s709_s23, %s709_s23 }
   0x7   :  { %p716_p3 = por %p715_p2, %p714_p1 }
   0x9   :  { %p717_p4 = pnand %p716_p3, %p710_p0 }
   0xb   :  { %720 = shalt.err (!%p717_p4)
}
   0xc   :  { %s768_s24 = smov 128   ;;  %s769_s25 = smov 8  }
   0xd   :  { %25 = dma.hbm_to_vmem [thread:$0]  %s900_s0, 512, %s20_s22, [#allocation4], %s768_s24, %s768_s24, %s769_s25  }
   0xe   :  { %s770_s28 = smov [#allocation6]  }
   0xf   :  { %s37_s29 = sshll.u32 %s770_s28, 4  ;;  %s38_s29 = int_to_ptr.vmem [resolvable:$true] %s37_s29 }
  0x10   :  { %s729_s30 = scalar_lea.vmem %s38_s29, 256  ;;  %p734_p6 = scmp.lt.s32.totalorder %s38_s29, %s38_s29 }
  0x11   :  { %p730_p5 = scmp.ne.s32.totalorder %s38_s29, %s729_s30  ;;  %p735_p7 = scmp.lt.s32.totalorder %s729_s30, %s729_s30 }
  0x13   :  { %p736_p8 = por %p735_p7, %p734_p6 }
  0x15   :  { %p737_p9 = pnand %p736_p8, %p730_p5 }
  0x17   :  { %740 = shalt.err (!%p737_p9)
}
  0x18   :  { %s771_s7 = smov 64   ;;  %s772_s8 = smov 4  }
  0x19   :  { %43 = dma.hbm_to_vmem [thread:$0]  %s904_s4, 256, %s38_s29, [#allocation7], %s771_s7, %s771_s7, %s772_s8  }
  0x1a   :  { %761 = dma.done.wait [#allocation4], 512  }
  0x1b   :  { %762 = vsyncadd [#allocation4], 4294966784 }
  0x1c   :  { %763 = dma.done.wait [#allocation7], 256  }
  0x1d   :  { %764 = vsyncadd [#allocation7], 4294967040  ;;  %v773_v0 = vmov 0   ;;  %v774_v1 = vmov 1   ;;  %v669_v2 = vld [vmem:[#allocation3 + $0x14] ss:$8 sps:$4 sm:$0xff]   ;;  %v203_v37 = vlaneseq }
  0x1e   :  { %150 = vmatprep.mubr.bf16.mxu0 %v773_v0  ;;  %664 = vset.pattern.permute.xlu0 %v773_v0  ;;  %v671_v3 = vld [vmem:[#allocation3 + $0x10] ss:$8 sps:$4 sm:$0xff]   ;;  %v672_v4 = vld [vmem:[#allocation3 + $0x4] ss:$8 sps:$4 sm:$0xff]   ;;  %v674_v5 = vld [vmem:[#allocation3] ss:$8 sps:$4 sm:$0xff]  }
  0x1f   :  { %665 = vset.pattern.permute.xlu1 %v774_v1  ;;  %130 = vmatprep.subr.bf16.mxu0 %v669_v2  ;;  %v192_v6 = vld [vmem:[%s901_s1 + $0x8] sm:$0xff]  ;;  %v675_v7 = vld [vmem:[%s903_s3] sm:$0xff]   ;;  %vm105_vm0 = vcmask 261120   ;;  %v193_v8 = vld [vmem:[%s901_s1 + $0x10] sm:$0xff]  ;;  %v204_v51 = vand.u32 127, %v203_v37  ;;  %vm272_vm2 = vcmask 1041409  }
  0x20   :  { %131 = vmatpush1.bf16.msra.mxu0 %v671_v3  ;;  %222 = vperm.xlu0 %664, %v192_v6   ;;  %v191_v9 = vld [vmem:[%s901_s1] sm:$0xff]  ;;  %v194_v10 = vld [vmem:[%s901_s1 + $0x18] sm:$0xff]  ;;  %v676_v11 = vld [vmem:[%s903_s3 + $0x8] sm:$0xff]   ;;  %vm275_vm3 = vcmask 1042434   ;;  %vm278_vm4 = vcmask 1043459   ;;  %vm281_vm5 = vcmask 1043456  }
  0x21   :  { %132 = vmatprep.subr.bf16.mxu0 %v672_v4  ;;  %378 = vperm.xlu1 %665, %v192_v6   ;;  %v677_v12 = vld [vmem:[%s903_s3 + $0x10] sm:$0xff]   ;;  %v678_v13 = vld [vmem:[%s903_s3 + $0x18] sm:$0xff]   ;;  %v195_v18 = vld [vmem:[%s902_s2] sm:$0xff]  ;;  %vm205_vm1 = vcmp.lt.s32.totalorder %v204_v51, 65  ;;  %vm777_vm6 = vmmov 0   ;;  %vm360_vm7 = vcmask 7168  }
  0x22   :  { %v196_v24 = vld [vmem:[%s902_s2 + $0x8] sm:$0xff]  ;;  %v197_v35 = vld [vmem:[%s902_s2 + $0x10] sm:$0xff]  ;;  %v198_v47 = vld [vmem:[%s902_s2 + $0x18] sm:$0xff]  ;;  %vm510_vm8 = vcmask 15368   ;;  %s778_s14 = smov [#allocation8]   ;;  %vm607_vm9 = vcmask 254976  }
  0x23   :  { %s615_s15 = sshll.u32 %s778_s14, 4  ;;  %s616_s15 = int_to_ptr.vmem [resolvable:$true] %s615_s15 }
  0x24   :  { %133 = vmatpush1.bf16.msra.mxu0 %v674_v5  ;;  %227 = vperm.xlu0 %664, %v193_v8   ;;  %s741_s16 = scalar_lea.vmem %s616_s15, 32  ;;  %p746_p11 = scmp.lt.s32.totalorder %s616_s15, %s616_s15 }
  0x25   :  { %666 = vset.pattern.permute.xlu1 %v773_v0  ;;  %p742_p10 = scmp.ne.s32.totalorder %s616_s15, %s741_s16  ;;  %p747_p12 = scmp.lt.s32.totalorder %s741_s16, %s741_s16 }
  0x26   :  { %217 = vperm.xlu1 %666, %v191_v9  }
  0x27   :  { %633 = vmatmul.mubr.msk.bf16.vlgmr.msra.gmra.mxu0 %vm105_vm0, %v675_v7  ;;  %p748_p13 = por %p747_p12, %p746_p11 }
  0x28   :  { %160 = vmatprep.mubr.bf16.mxu0 %v773_v0  ;;  %232 = vperm.xlu0 %664, %v194_v10  }
  0x29   :  { %p749_p0 = pnand %p748_p13, %p742_p10 }
  0x2a   :  { %667 = vset.pattern.permute.xlu1 %v774_v1 }
  0x2b   :  { %382 = vperm.xlu1 %667, %v193_v8  }
  0x2c   :  { %668 = vset.pattern.permute.xlu0 %v774_v1 }
  0x2d   :  { %374 = vperm.xlu0 %668, %v191_v9  }
  0x2f   :  { %634 = vmatmul.mubr.msk.bf16.gmra.mxu0 %vm105_vm0, %v676_v11  ;;  %386 = vperm.xlu1 %667, %v194_v10  }
  0x30   :  { %170 = vmatprep.mubr.bf16.mxu0 %v773_v0 }
  0x37   :  { %635 = vmatmul.mubr.msk.bf16.gmra.mxu0 %vm105_vm0, %v677_v12 }
  0x38   :  { %180 = vmatprep.mubr.bf16.mxu0 %v773_v0 }
  0x3f   :  { %636 = vmatmul.mubr.msk.bf16.gmra.mxu0 %vm105_vm0, %v678_v13 }
  0x9b   :  { %v223_v14 = vpop.permute.xlu0 %222 }
  0x9c   :  { %v379_v16 = vpop.permute.xlu1 %378 }
  0x9f   :  { %v228_v15 = vpop.permute.xlu0 %227 }
  0xa1   :  { %v218_v20 = vpop.permute.xlu1 %217 }
  0xa3   :  { %v233_v17 = vpop.permute.xlu0 %232 }
  0xa6   :  { %v383_v41 = vpop.permute.xlu1 %382 }
  0xa8   :  { %v375_v23 = vpop.permute.xlu0 %374 }
  0xaa   :  { %v387_v62 = vpop.permute.xlu1 %386 }
  0xe7   :  { %v152_v19 = vpop.f32.mrf.mxu0 }
  0xe8   :  { %v207_v21 = vadd.f32 %v195_v18, %v152_v19 }
  0xe9   :  { %v154_v22 = vpop.f32.mrf.mxu0 }
  0xea   :  { %v235_v25 = vmul.f32 %v218_v20, %v207_v21  ;;  %v365_v26 = vadd.f32 %v195_v18, %v154_v22  ;;  %v775_v18 = vmov -1e+30  }
  0xeb   :  { %v156_v27 = vpop.f32.mrf.mxu0  ;;  %v206_v19 = vsel %vm205_vm1, 0.0, %v775_v18 }
  0xec   :  { %v239_v28 = vrot.slane %v235_v25, 4  ;;  %v389_v29 = vmul.f32 %v375_v23, %v365_v26  ;;  %v208_v30 = vadd.f32 %v196_v24, %v156_v27 }
  0xed   :  { %v158_v31 = vpop.f32.mrf.mxu0 }
  0xee   :  { %v393_v32 = vrot.slane %v389_v29, 4  ;;  %v236_v33 = vmul.f32 %v223_v14, %v208_v30  ;;  %v366_v34 = vadd.f32 %v196_v24, %v158_v31  ;;  %v240_v38 = vadd.f32 %v239_v28, %v235_v25 }
  0xef   :  { %v162_v36 = vpop.f32.mrf.mxu0 }
  0xf0   :  { %v245_v39 = vrot.slane %v236_v33, 4  ;;  %v390_v40 = vmul.f32 %v379_v16, %v366_v34  ;;  %v209_v42 = vadd.f32 %v197_v35, %v162_v36  ;;  %v394_v44 = vadd.f32 %v393_v32, %v389_v29 }
  0xf1   :  { %v164_v43 = vpop.f32.mrf.mxu0  ;;  %v241_v52 = vrot.slane %v240_v38, 2 }
  0xf2   :  { %v246_v45 = vadd.f32 %v245_v39, %v236_v33  ;;  %v399_v46 = vrot.slane %v390_v40, 4  ;;  %v237_v48 = vmul.f32 %v228_v15, %v209_v42  ;;  %v367_v49 = vadd.f32 %v197_v35, %v164_v43 }
  0xf3   :  { %v166_v50 = vpop.f32.mrf.mxu0  ;;  %v395_v59 = vrot.slane %v394_v44, 2  ;;  %v242_v3 = vadd.f32 %v241_v52, %v240_v38 }
  0xf4   :  { %v247_v53 = vrot.slane %v246_v45, 2  ;;  %v400_v54 = vadd.f32 %v399_v46, %v390_v40  ;;  %v251_v55 = vrot.slane %v237_v48, 4  ;;  %v391_v56 = vmul.f32 %v383_v41, %v367_v49 }
  0xf5   :  { %v210_v57 = vadd.f32 %v198_v47, %v166_v50  ;;  %v168_v58 = vpop.f32.mrf.mxu0  ;;  %v396_v10 = vadd.f32 %v395_v59, %v394_v44 }
  0xf6   :  { %v248_v60 = vadd.f32 %v247_v53, %v246_v45  ;;  %v401_v61 = vrot.slane %v400_v54, 2  ;;  %v252_v63 = vadd.f32 %v251_v55, %v237_v48  ;;  %v405_v0 = vrot.slane %v391_v56, 4 }
  0xf7   :  { %v238_v1 = vmul.f32 %v233_v17, %v210_v57  ;;  %v368_v2 = vadd.f32 %v198_v47, %v168_v58  ;;  %v243_v17 = vrot.slane %v242_v3, 1  ;;  %v397_v25 = vrot.slane %v396_v10, 1 }
  0xf8   :  { %v249_v4 = vrot.slane %v248_v60, 1  ;;  %v402_v5 = vadd.f32 %v401_v61, %v400_v54  ;;  %v253_v6 = vrot.slane %v252_v63, 2  ;;  %v406_v7 = vadd.f32 %v405_v0, %v391_v56 }
  0xf9   :  { %v257_v8 = vrot.slane %v238_v1, 4  ;;  %v392_v9 = vmul.f32 %v387_v62, %v368_v2  ;;  %v244_v31 = vadd.f32 %v243_v17, %v242_v3  ;;  %v398_v38 = vadd.f32 %v397_v25, %v396_v10 }
  0xfa   :  { %v250_v11 = vadd.f32 %v249_v4, %v248_v60  ;;  %v403_v12 = vrot.slane %v402_v5, 1  ;;  %v254_v13 = vadd.f32 %v253_v6, %v252_v63  ;;  %v407_v14 = vrot.slane %v406_v7, 2 }
  0xfb   :  { %v258_v15 = vadd.f32 %v257_v8, %v238_v1  ;;  %v411_v16 = vrot.slane %v392_v9, 4  ;;  %v263_v44 = vadd.f32 %v244_v31, %v206_v19  ;;  %v417_v49 = vadd.f32 %v398_v38, %v206_v19 }
  0xfc   :  { %v404_v20 = vadd.f32 %v403_v12, %v402_v5  ;;  %v255_v21 = vrot.slane %v254_v13, 1  ;;  %v408_v22 = vadd.f32 %v407_v14, %v406_v7  ;;  %v264_v26 = vadd.f32 %v250_v11, %v206_v19 }
  0xfd   :  { %v259_v23 = vrot.slane %v258_v15, 2  ;;  %v412_v24 = vadd.f32 %v411_v16, %v392_v9 }
  0xfe   :  { %v256_v27 = vadd.f32 %v255_v21, %v254_v13  ;;  %v409_v28 = vrot.slane %v408_v22, 1  ;;  %v418_v32 = vadd.f32 %v404_v20, %v206_v19  ;;  %v271_v42 = vrot.slane %v264_v26, 7 }
  0xff   :  { %v260_v29 = vadd.f32 %v259_v23, %v258_v15  ;;  %v413_v30 = vrot.slane %v412_v24, 2 }
 0x100   :  { %v410_v33 = vadd.f32 %v409_v28, %v408_v22  ;;  %v265_v36 = vadd.f32 %v256_v27, %v206_v19  ;;  %v425_v47 = vrot.slane %v418_v32, 7  ;;  %v273_v50 = vsel %vm272_vm2, %v271_v42, %v263_v44 }
 0x101   :  { %v261_v34 = vrot.slane %v260_v29, 1  ;;  %v414_v35 = vadd.f32 %v413_v30, %v412_v24 }
 0x102   :  { %v419_v39 = vadd.f32 %v410_v33, %v206_v19  ;;  %v274_v43 = vrot.slane %v265_v36, 6  ;;  %v426_v55 = vsel %vm272_vm2, %v425_v47, %v417_v49 }
 0x103   :  { %v262_v40 = vadd.f32 %v261_v34, %v260_v29  ;;  %v415_v41 = vrot.slane %v414_v35, 1 }
 0x104   :  { %v427_v48 = vrot.slane %v419_v39, 6  ;;  %v276_v53 = vsel %vm275_vm3, %v274_v43, %v273_v50  ;;  %v333_v50 = vshrl.u32 %v203_v37, 7  ;;  %v202_v37 = vld [vmem:[%s902_s2 + $0x38] sm:$0xff] }
 0x105   :  { %v416_v45 = vadd.f32 %v415_v41, %v414_v35  ;;  %v266_v46 = vadd.f32 %v262_v40, %v206_v19 }
 0x106   :  { %v428_v58 = vsel %vm275_vm3, %v427_v48, %v426_v55  ;;  %v200_v55 = vld [vmem:[%s902_s2 + $0x28] sm:$0xff] }
 0x107   :  { %v277_v51 = vrot.slane %v266_v46, 5  ;;  %v420_v52 = vadd.f32 %v416_v45, %v206_v19 }
 0x109   :  { %v279_v54 = vsel %vm278_vm4, %v277_v51, %v276_v53  ;;  %v429_v56 = vrot.slane %v420_v52, 5 }
 0x10a   :  { %v282_v57 = vsel %vm281_vm5, %v279_v54, -inf  ;;  %v199_v54 = vld [vmem:[%s902_s2 + $0x20] sm:$0xff] }
 0x10b   :  { %283 = vmax.xlane.f32.xlu1 %v282_v57  ;;  %v430_v59 = vsel %vm278_vm4, %v429_v56, %v428_v58 }
 0x10c   :  { %v432_v60 = vsel %vm281_vm5, %v430_v59, -inf }
 0x10d   :  { %433 = vmax.xlane.f32.xlu0 %v432_v60 }
 0x194   :  { %v284_v61 = vpop.xlane.xlu1 %283 }
 0x195   :  { %v286_v62 = vrot.slane %v284_v61, 1  ;;  %v287_v63 = vrot.slane %v284_v61, 2  ;;  %v288_v0 = vrot.slane %v284_v61, 3  ;;  %v293_v1 = vsub.f32 %v263_v44, %v284_v61  ;;  %v172_v44 = vpop.f32.mrf.mxu0 }
 0x196   :  { %v434_v2 = vpop.xlane.xlu0 %433  ;;  %v211_v61 = vadd.f32 %v199_v54, %v172_v44 }
 0x197   :  { %v294_v3 = vsub.f32 %v264_v26, %v286_v62  ;;  %v295_v4 = vsub.f32 %v265_v36, %v287_v63  ;;  %v296_v5 = vsub.f32 %v266_v46, %v288_v0  ;;  %v297_v6 = vmul.f32 1.442695, %v293_v1  ;;  %v174_v45 = vpop.f32.mrf.mxu0 }
 0x198   :  { %v436_v7 = vrot.slane %v434_v2, 1  ;;  %v437_v8 = vrot.slane %v434_v2, 2  ;;  %v438_v9 = vrot.slane %v434_v2, 3  ;;  %v443_v10 = vsub.f32 %v417_v49, %v434_v2 }
 0x199   :  { %681 = vpow2.f32 %v297_v6  ;;  %v299_v11 = vmul.f32 1.442695, %v294_v3  ;;  %v301_v12 = vmul.f32 1.442695, %v295_v4  ;;  %v303_v13 = vmul.f32 1.442695, %v296_v5  ;;  %v176_v47 = vpop.f32.mrf.mxu0 }
 0x19a   :  { %v444_v14 = vsub.f32 %v418_v32, %v436_v7  ;;  %v445_v15 = vsub.f32 %v419_v39, %v437_v8  ;;  %v446_v16 = vsub.f32 %v420_v52, %v438_v9  ;;  %v447_v18 = vmul.f32 1.442695, %v443_v10  ;;  %v201_v9 = vld [vmem:[%s902_s2 + $0x30] sm:$0xff] }
 0x19b   :  { %683 = vpow2.f32 %v299_v11  ;;  %v178_v49 = vpop.f32.mrf.mxu0  ;;  %v334_v52 = vsub.s32 0, %v333_v50  ;;  %v212_v2 = vadd.f32 %v200_v55, %v176_v47  ;;  %v369_v8 = vadd.f32 %v199_v54, %v174_v45 }
 0x19c   :  { %685 = vpow2.f32 %v301_v12  ;;  %v449_v19 = vmul.f32 1.442695, %v444_v14  ;;  %v451_v17 = vmul.f32 1.442695, %v445_v15  ;;  %v453_v20 = vmul.f32 1.442695, %v446_v16 }
 0x19d   :  { %687 = vpow2.f32 %v303_v13  ;;  %v182_v51 = vpop.f32.mrf.mxu0 }
 0x19e   :  { %689 = vpow2.f32 %v447_v18 }
 0x19f   :  { %691 = vpow2.f32 %v449_v19  ;;  %v184_v56 = vpop.f32.mrf.mxu0  ;;  %v213_v19 = vadd.f32 %v201_v9, %v182_v51 }
 0x1a0   :  { %693 = vpow2.f32 %v451_v17 }
 0x1a1   :  { %695 = vpow2.f32 %v453_v20  ;;  %v186_v3 = vpop.f32.mrf.mxu0 }
 0x1a2   :  { %v214_v10 = vadd.f32 %v202_v37, %v186_v3 }
 0x1a6   :  { %v682_v21 = vpop.eup %681 }
 0x1a8   :  { %v684_v22 = vpop.eup %683 }
 0x1a9   :  { %v686_v23 = vpop.eup %685  ;;  %v309_v24 = vrot.slane %v684_v22, 7 }
 0x1aa   :  { %v688_v25 = vpop.eup %687  ;;  %v311_v26 = vrot.slane %v686_v23, 6 }
 0x1ab   :  { %v690_v27 = vpop.eup %689  ;;  %v310_v28 = vsel %vm272_vm2, %v309_v24, %v682_v21  ;;  %v313_v29 = vrot.slane %v688_v25, 5 }
 0x1ac   :  { %v692_v30 = vpop.eup %691  ;;  %v312_v31 = vsel %vm275_vm3, %v311_v26, %v310_v28  ;;  %v188_v28 = vpop.f32.mrf.mxu0 }
 0x1ad   :  { %v694_v32 = vpop.eup %693  ;;  %v314_v33 = vsel %vm278_vm4, %v313_v29, %v312_v31  ;;  %v459_v34 = vrot.slane %v692_v30, 7  ;;  %v371_v29 = vadd.f32 %v201_v9, %v184_v56  ;;  %v637_v56 = vld [vmem:[%s905_s5] ss:$0 sm:$0xff] }
 0x1ae   :  { %v696_v35 = vpop.eup %695  ;;  %v316_v36 = vsel %vm281_vm5, %v314_v33, 0.0  ;;  %v461_v38 = vrot.slane %v694_v32, 6 }
 0x1af   :  { %317 = vadd.xlane.f32.xlu0 %v316_v36  ;;  %v460_v39 = vsel %vm272_vm2, %v459_v34, %v690_v27  ;;  %v463_v40 = vrot.slane %v696_v35, 5  ;;  %v372_v34 = vadd.f32 %v202_v37, %v188_v28 }
 0x1b0   :  { %v462_v41 = vsel %vm275_vm3, %v461_v38, %v460_v39  ;;  %v776_v38 = vmov 0.0   ;;  %v680_v39 = vld [vmem:[#allocation6] sm:$0xff]  }
 0x1b1   :  { %v464_v42 = vsel %vm278_vm4, %v463_v40, %v462_v41  ;;  %644 = vmatprep.subr.bf16.mxu1 %v776_v38  ;;  %648 = vmatprep.mubr.msk.bf16.mxu1 %vm777_vm6, %v776_v38  ;;  %v562_v40 = vsel %vm105_vm0, %v680_v39, 0 }
 0x1b2   :  { %v466_v43 = vsel %vm281_vm5, %v464_v42, 0.0 }
 0x1b3   :  { %467 = vadd.xlane.f32.xlu1 %v466_v43 }
 0x238   :  { %v318_v46 = vpop.xlane.xlu0 %317 }
 0x239   :  { %697 = vrcp.f32 %v318_v46 }
 0x23c   :  { %v468_v48 = vpop.xlane.xlu1 %467 }
 0x23d   :  { %699 = vrcp.f32 %v468_v48 }
 0x246   :  { %v698_v53 = vpop.eup %697 }
 0x247   :  { %v328_v57 = vmul.f32 %v698_v53, %v682_v21  ;;  %v321_v58 = vrot.slane %v698_v53, 1  ;;  %v323_v59 = vrot.slane %v698_v53, 3  ;;  %v322_v60 = vrot.slane %v698_v53, 2 }
 0x249   :  { %v335_v62 = vrot.slane %v328_v57, %v334_v52  ;;  %v329_v63 = vmul.f32 %v684_v22, %v321_v58  ;;  %v331_v0 = vmul.f32 %v688_v25, %v323_v59  ;;  %v330_v7 = vmul.f32 %v686_v23, %v322_v60 }
 0x24a   :  { %v700_v1 = vpop.eup %699  ;;  %v370_v25 = vadd.f32 %v200_v55, %v178_v49 }
 0x24b   :  { %v348_v4 = vmul.f32 %v335_v62, %v211_v61  ;;  %v339_v5 = vrot.slane %v329_v63, %v334_v52  ;;  %v478_v6 = vmul.f32 %v700_v1, %v690_v27  ;;  %v471_v11 = vrot.slane %v700_v1, 1 }
 0x24c   :  { %v472_v12 = vrot.slane %v700_v1, 2  ;;  %v347_v15 = vrot.slane %v331_v0, %v334_v52  ;;  %v473_v16 = vrot.slane %v700_v1, 3  ;;  %v343_v20 = vrot.slane %v330_v7, %v334_v52 }
 0x24d   :  { %352 = vadd.xlane.f32.xlu0 %v348_v4  ;;  %v349_v13 = vmul.f32 %v339_v5, %v212_v2  ;;  %v485_v14 = vrot.slane %v478_v6, %v334_v52  ;;  %v479_v18 = vmul.f32 %v692_v30, %v471_v11 }
 0x24e   :  { %v480_v21 = vmul.f32 %v694_v32, %v472_v12  ;;  %v351_v22 = vmul.f32 %v347_v15, %v214_v10  ;;  %v481_v24 = vmul.f32 %v696_v35, %v473_v16  ;;  %v350_v26 = vmul.f32 %v343_v20, %v213_v19  ;;  %v679_v32 = vld [vmem:[#allocation6 + $0x8] sm:$0xff]  }
 0x24f   :  { %354 = vadd.xlane.f32.xlu1 %v349_v13  ;;  %v498_v17 = vmul.f32 %v485_v14, %v369_v8  ;;  %v489_v23 = vrot.slane %v479_v18, %v334_v52  ;;  %v565_v35 = vsel %vm105_vm0, %v679_v32, 0 }
 0x250   :  { %v493_v27 = vrot.slane %v480_v21, %v334_v52  ;;  %v497_v33 = vrot.slane %v481_v24, %v334_v52  ;;  %645 = vmatpush3.bf16.xpose.msra.mxu1 %v565_v35 }
 0x251   :  { %502 = vadd.xlane.f32.xlu0 %v498_v17  ;;  %v499_v31 = vmul.f32 %v489_v23, %v370_v25  ;;  %646 = vmatprep.subr.bf16.mxu1 %v776_v38 }
 0x252   :  { %v500_v30 = vmul.f32 %v493_v27, %v371_v29  ;;  %v501_v36 = vmul.f32 %v497_v33, %v372_v34 }
 0x253   :  { %358 = vadd.xlane.f32.xlu1 %v351_v22 }
 0x255   :  { %356 = vadd.xlane.f32.xlu0 %v350_v26 }
 0x257   :  { %504 = vadd.xlane.f32.xlu1 %v499_v31 }
 0x258   :  { %647 = vmatpush3.bf16.xpose.msra.mxu1 %v562_v40 }
 0x259   :  { %506 = vadd.xlane.f32.xlu0 %v500_v30 }
 0x25b   :  { %508 = vadd.xlane.f32.xlu1 %v501_v36 }
 0x2d6   :  { %v353_v41 = vpop.xlane.xlu0 %352 }
 0x2d7   :  { %361 = vst.msk [vmem:[#allocation2] sm:$0xff] %vm360_vm7, %v353_v41 }
 0x2d8   :  { %v355_v42 = vpop.xlane.xlu1 %354 }
 0x2d9   :  { %362 = vst.msk [vmem:[#allocation2 + $0x8] sm:$0xff] %vm360_vm7, %v355_v42 }
 0x2da   :  { %v503_v43 = vpop.xlane.xlu0 %502 }
 0x2db   :  { %511 = vst.msk [vmem:[#allocation2] sm:$0xff] %vm510_vm8, %v503_v43 }
 0x2dc   :  { %v359_v44 = vpop.xlane.xlu1 %358 }
 0x2dd   :  { %364 = vst.msk [vmem:[#allocation2 + $0x18] sm:$0xff] %vm360_vm7, %v359_v44 }
 0x2de   :  { %v357_v45 = vpop.xlane.xlu0 %356 }
 0x2df   :  { %363 = vst.msk [vmem:[#allocation2 + $0x10] sm:$0xff] %vm360_vm7, %v357_v45 }
 0x2e0   :  { %v505_v46 = vpop.xlane.xlu1 %504 }
 0x2e1   :  { %512 = vst.msk [vmem:[#allocation2 + $0x8] sm:$0xff] %vm510_vm8, %v505_v46 }
 0x2e2   :  { %v507_v47 = vpop.xlane.xlu0 %506  ;;  %v515_v49 = vld [vmem:[#allocation2] sm:$0xff] }
 0x2e3   :  { %513 = vst.msk [vmem:[#allocation2 + $0x10] sm:$0xff] %vm510_vm8, %v507_v47 }
 0x2e4   :  { %v509_v48 = vpop.xlane.xlu1 %508 }
 0x2e5   :  { %514 = vst.msk [vmem:[#allocation2 + $0x18] sm:$0xff] %vm510_vm8, %v509_v48 }
 0x2e8   :  { %v516_v50 = vld [vmem:[#allocation2 + $0x8] sm:$0xff] }
 0x2e9   :  { %v519_v51 = vpack.c.bf16 %v516_v50, %v515_v49 }
 0x2ea   :  { %v517_v52 = vld [vmem:[#allocation2 + $0x10] sm:$0xff] }
 0x2eb   :  { %532 = vxpose.xlu0.c.b16.start [1/2] (short) (narrow) %v519_v51, 16 }
 0x2ec   :  { %v518_v53 = vld [vmem:[#allocation2 + $0x18] sm:$0xff] }
 0x2ed   :  { %v520_v54 = vpack.c.bf16 %v518_v53, %v517_v52 }
 0x2ef   :  { %533 = vxpose.xlu0.c.b16.end [2/2] (short) (narrow) %v520_v54, 16 }
 0x34d   :  { %v540_v55 = vpop.trf.xlu0 }
 0x34e   :  { %649 = vmatmul.mubr.msk.bf16.vlgmr.msra.gmra.mxu1 %vm105_vm0, %v540_v55 }
 0x40e   :  { %v601_v57 = vpop.f32.mrf.mxu1 }
 0x40f   :  { %v602_v58 = vadd.f32 %v637_v56, %v601_v57 }
 0x410   :  { %v650_v59 = vpop.f32.mrf.mxu1 }
 0x411   :  { %608 = vst.msk [vmem:[#allocation8] sm:$0x3] %vm607_vm9, %v602_v58 }
 0x412   :  { %v604_v60 = vpop.f32.mrf.mxu1 }
 0x413   :  { %752 = shalt.err (!%p749_p0)
}
 0x414   :  { %618 = dma.vmem_to_hbm [thread:$0]  %s616_s15, 32, %s906_s6, [#allocation5]   ;;  %v651_v61 = vpop.f32.mrf.mxu1 }
 0x415   :  { %765 = dma.done.wait [#allocation5], 32  }
 0x416   :  { %766 = vsyncadd [#allocation5], 4294967264 }
 0x417   :  { %622 = vsyncpa [#allocation4], 1 }
 0x418   :  { %623 = vsyncpa [#allocation7], 1 }
 0x419   :  { %624 = vsyncpa [#allocation5], 1 }

</bundles_post_ra>
